<compile_context>
chip_gen: v7x
topology: tpu7x:2x2x1
jax: 0.10.0
libtpu: 0.0.40
codegen_flags: <defaults>
</compile_context>

<pallas_src>
import functools

import jax
import jax.numpy as jnp
from jax.experimental import pallas as pl
from jax.experimental.pallas import tpu as pltpu


def _round_up(x, m):
    return (x + m - 1) // m * m


def _cdiv(a, b):
    return (a + b - 1) // b


def _wide_lanes_ok():
    """tn=256 only where the MXU is 256-wide (v6e/v7x); 128 on v4/v5."""
    try:
        kind = jax.devices()[0].device_kind.lower()
        return not ("v4" in kind or "v5" in kind)
    except Exception:  # pragma: no cover - be conservative off-TPU
        return False


def _leaky(y):
    return jnp.where(y > 0, y, jnp.float32(0.01) * y)


# ----------------------------------------------------------------------------
# Matmul + bias + LeakyReLU kernels (used for conv1 via XLA im2col)
# ----------------------------------------------------------------------------
def _mm_single_k_kernel(x_ref, w_ref, b_ref, o_ref, *, activation):
    # Single reduction step: no accumulator scratch, write straight to o_ref.
    y = jnp.dot(x_ref[...], w_ref[...], preferred_element_type=jnp.float32)
    y = y + b_ref[...]
    if activation == "leaky_relu":
        y = _leaky(y)
    o_ref[...] = y.astype(o_ref.dtype)


def _mm_multi_k_kernel(x_ref, w_ref, b_ref, o_ref, acc_ref, *, activation):
    k = pl.program_id(2)

    @pl.when(k == 0)
    def _():
        acc_ref[...] = jnp.zeros_like(acc_ref)

    acc_ref[...] += jnp.dot(x_ref[...], w_ref[...],
                            preferred_element_type=jnp.float32)

    @pl.when(k == pl.num_programs(2) - 1)
    def _():
        y = acc_ref[...] + b_ref[...]          # bias only read in the epilogue
        if activation == "leaky_relu":
            y = _leaky(y)
        o_ref[...] = y.astype(o_ref.dtype)


def matmul_bias_act(x, w, b, *, activation="leaky_relu", out_dtype=jnp.bfloat16):
    """(M,K) @ (K,N) + b[N], fused activation.

    Returns (M, Np) with Np = round_up(N, 128); padded lanes are exact zeros
    (zero weight columns / zero bias, LeakyReLU(0)=0).
    """
    M, K = x.shape
    K2, N = w.shape
    assert K == K2 and b.shape == (N,)

    Np = _round_up(N, 128)
    tn = 256 if (_wide_lanes_ok() and Np % 256 == 0) else 128

    # M tile: target 512; for small M prefer >=2 blocks so both megacore TCs
    # get work.
    if M >= 1024:
        tm = 512
    else:
        tm = min(512, _round_up(max(_cdiv(M, 2), 8), 16))
    Mp = _round_up(M, tm)

    # K: single reduction step whenever it fits comfortably; no K padding then.
    if K <= 2048:
        tk, Kp = K, K
    else:
        tk = 512
        Kp = _round_up(K, tk)
    ksteps = Kp // tk

    xp = x.astype(jnp.bfloat16)
    if (Mp, Kp) != (M, K):
        xp = jnp.pad(xp, ((0, Mp - M), (0, Kp - K)))
    wp = jnp.pad(w.astype(jnp.bfloat16), ((0, Kp - K), (0, Np - N)))
    bp = jnp.pad(b.astype(jnp.float32), (0, Np - N)).reshape(1, Np)

    cost = pl.CostEstimate(
        flops=2 * Mp * Kp * Np,
        transcendentals=0,
        bytes_accessed=xp.size * 2 + wp.size * 2 + bp.size * 4
        + Mp * Np * jnp.dtype(out_dtype).itemsize)

    if ksteps == 1:
        out = pl.pallas_call(
            functools.partial(_mm_single_k_kernel, activation=activation),
            out_shape=jax.ShapeDtypeStruct((Mp, Np), out_dtype),
            grid_spec=pltpu.PrefetchScalarGridSpec(
                num_scalar_prefetch=0,
                grid=(Mp // tm, Np // tn),
                in_specs=[
                    pl.BlockSpec((tm, Kp), lambda i, j: (i, 0)),
                    pl.BlockSpec((Kp, tn), lambda i, j: (0, j)),
                    pl.BlockSpec((1, tn), lambda i, j: (0, j)),
                ],
                out_specs=pl.BlockSpec((tm, tn), lambda i, j: (i, j)),
            ),
            compiler_params=pltpu.CompilerParams(
                dimension_semantics=("parallel", "parallel")),
            cost_estimate=cost,
        )(xp, wp, bp)
    else:
        out = pl.pallas_call(
            functools.partial(_mm_multi_k_kernel, activation=activation),
            out_shape=jax.ShapeDtypeStruct((Mp, Np), out_dtype),
            grid_spec=pltpu.PrefetchScalarGridSpec(
                num_scalar_prefetch=0,
                grid=(Mp // tm, Np // tn, ksteps),
                in_specs=[
                    pl.BlockSpec((tm, tk), lambda i, j, k: (i, k)),
                    pl.BlockSpec((tk, tn), lambda i, j, k: (k, j)),
                    pl.BlockSpec((1, tn), lambda i, j, k: (0, j)),
                ],
                out_specs=pl.BlockSpec((tm, tn), lambda i, j, k: (i, j)),
                scratch_shapes=[pltpu.VMEM((tm, tn), jnp.float32)],
            ),
            compiler_params=pltpu.CompilerParams(
                dimension_semantics=("parallel", "parallel", "arbitrary")),
            cost_estimate=cost,
        )(xp, wp, bp)

    return out[:M]


# ----------------------------------------------------------------------------
# Fused stride-1 'same' 3x3 conv kernel: im2col performed in-kernel
# ----------------------------------------------------------------------------
def _conv3x3_s1_kernel(x0_ref, x1_ref, w_ref, b_ref, o_ref, *, offsets,
                       activation):
    tm = o_ref.shape[0]
    # x0/x1 are two consecutive M-blocks of the flattened padded activation;
    # together they cover every tap window (max offset <= tm by construction).
    # Work in f32 in-registers (HBM operands stay bf16): unaligned sublane
    # slices on f32 values are the best-supported relayout path.
    x = jnp.concatenate([x0_ref[...], x1_ref[...]], axis=0).astype(jnp.float32)

    acc = None
    for t, off in enumerate(offsets):           # 9 static tap offsets, unrolled
        xs = x[off:off + tm, :]                                # (tm, C)
        wt = w_ref[t].astype(jnp.float32)                      # (C, tn)
        d = jnp.dot(xs, wt, preferred_element_type=jnp.float32)
        acc = d if acc is None else acc + d

    y = acc + b_ref[...]
    if activation == "leaky_relu":
        y = _leaky(y)
    o_ref[...] = y.astype(o_ref.dtype)


def fused_conv3x3_same(x_nhwc, w, b, *, activation="leaky_relu",
                       out_dtype=jnp.bfloat16):
    """Stride-1 'same' 3x3 conv + bias + LeakyReLU as ONE Pallas kernel.

    x_nhwc: (N,H,W,Cx) (Cx may exceed the weight's Cin: zero-padded channels);
    w: (3,3,Cin,Cout) HWIO; b: (Cout,).
    Returns (N, H, W, Coutp) with Coutp = round_up(Cout, 128); padded lanes are
    exact zeros.
    """
    N, H, W, Cx = x_nhwc.shape
    kh, kw, Cin, Cout = w.shape
    assert (kh, kw) == (3, 3)
    if Cx != Cin:
        assert Cx > Cin
        w = jnp.pad(w, ((0, 0), (0, 0), (0, Cx - Cin), (0, 0)))   # inert rows

    Hp, Wp = H + 2, W + 2
    M = N * Hp * Wp                       # output computed on the padded grid

    Coutp = _round_up(Cout, 128)
    tn = 256 if (_wide_lanes_ok() and Coutp % 256 == 0) else 128

    halo = 2 * Wp + 2                     # largest tap offset (di=dj=2)
    halo_min = _round_up(halo, 16)        # two blocks must cover every window
    if M >= 1024:
        tm = max(512, halo_min)
    else:
        tm = max(halo_min, min(512, _round_up(max(_cdiv(M, 2), 8), 16)))
    nblk = _cdiv(M, tm)
    Mp = (nblk + 1) * tm                  # +1 zero block so the halo fetch exists

    # bf16 cast + spatial zero-pad + flatten + row-pad: all on the activation,
    # never on a 9x patches tensor.
    xpad = jnp.pad(x_nhwc.astype(jnp.bfloat16),
                   ((0, 0), (1, 1), (1, 1), (0, 0)))
    xf = jnp.pad(xpad.reshape(M, Cx), ((0, Mp - M), (0, 0)))

    wf = jnp.pad(w.astype(jnp.bfloat16).reshape(9, Cx, Cout),
                 ((0, 0), (0, 0), (0, Coutp - Cout)))             # (9, Cx, Coutp)
    bp = jnp.pad(b.astype(jnp.float32), (0, Coutp - Cout)).reshape(1, Coutp)

    offsets = tuple(di * Wp + dj for di in range(3) for dj in range(3))

    cost = pl.CostEstimate(
        flops=2 * (nblk * tm) * 9 * Cx * Coutp,
        transcendentals=0,
        bytes_accessed=2 * xf.size * 2 + wf.size * 2 + bp.size * 4
        + nblk * tm * Coutp * jnp.dtype(out_dtype).itemsize)

    out = pl.pallas_call(
        functools.partial(_conv3x3_s1_kernel, offsets=offsets,
                          activation=activation),
        out_shape=jax.ShapeDtypeStruct((nblk * tm, Coutp), out_dtype),
        grid_spec=pltpu.PrefetchScalarGridSpec(
            num_scalar_prefetch=0,
            grid=(nblk, Coutp // tn),
            in_specs=[
                pl.BlockSpec((tm, Cx), lambda i, j: (i, 0)),       # block i
                pl.BlockSpec((tm, Cx), lambda i, j: (i + 1, 0)),   # halo block
                pl.BlockSpec((9, Cx, tn), lambda i, j: (0, 0, j)),
                pl.BlockSpec((1, tn), lambda i, j: (0, j)),
            ],
            out_specs=pl.BlockSpec((tm, tn), lambda i, j: (i, j)),
        ),
        compiler_params=pltpu.CompilerParams(
            dimension_semantics=("parallel", "parallel")),
        cost_estimate=cost,
    )(xf, xf, wf, bp)

    # Valid outputs live at rows n*Hp*Wp + h*Wp + w with h < H, w < W.
    out = out[:M].reshape(N, Hp, Wp, Coutp)[:, :H, :W, :]
    return out


# ----------------------------------------------------------------------------
# Stride-2 conv (conv1): XLA im2col (2.25x, not 9x) + fused matmul kernel
# ----------------------------------------------------------------------------
def conv3x3_stride2(x_nhwc, w, b, *, activation="leaky_relu",
                    out_dtype=jnp.bfloat16):
    N, H, W, Cx = x_nhwc.shape
    kh, kw, Cin, Cout = w.shape
    assert (kh, kw) == (3, 3)
    if Cx != Cin:
        assert Cx > Cin
        w = jnp.pad(w, ((0, 0), (0, 0), (0, Cx - Cin), (0, 0)))

    xb = x_nhwc.astype(jnp.bfloat16)                 # cast folded into producer
    xp = jnp.pad(xb, ((0, 0), (1, 1), (1, 1), (0, 0)))
    Ho = (H + 2 - 3) // 2 + 1
    Wo = (W + 2 - 3) // 2 + 1
    cols = [xp[:, i:i + 2 * (Ho - 1) + 1:2, j:j + 2 * (Wo - 1) + 1:2, :]
            for i in range(3) for j in range(3)]
    patches = jnp.concatenate(cols, axis=-1)         # (N,Ho,Wo,9*Cx) bf16
    xm = patches.reshape(N * Ho * Wo, 9 * Cx)
    wm = w.reshape(9 * Cx, Cout)
    y = matmul_bias_act(xm, wm, b, activation=activation, out_dtype=out_dtype)
    return y.reshape(N, Ho, Wo, y.shape[-1])


def _maybe_strip_channels(y, cout):
    """Carry lane padding only when cheap (ratio <= 1.25); otherwise slice."""
    cp = y.shape[-1]
    if cp == cout or cp / cout <= 1.25:
        return y
    return y[..., :cout]


# ----------------------------------------------------------------------------
# double_conv11 forward
# ----------------------------------------------------------------------------
def double_conv11(params, x_nchw):
    (w1, b1), (w2, b2), (w3, b3) = params
    c1, c2, c3 = w1.shape[-1], w2.shape[-1], w3.shape[-1]

    x = jnp.transpose(x_nchw, (0, 2, 3, 1))                 # NCHW -> NHWC
    y = conv3x3_stride2(x, w1, b1, out_dtype=jnp.bfloat16)
    y = _maybe_strip_channels(y, c1)

    y = fused_conv3x3_same(y, w2, b2, out_dtype=jnp.bfloat16)
    y = _maybe_strip_channels(y, c2)

    y = fused_conv3x3_same(y, w3, b3, out_dtype=jnp.float32)
    y = y[..., :c3]                                          # final: real channels
    return jnp.transpose(y, (0, 3, 1, 2))                    # NHWC -> NCHW


# ----------------------------------------------------------------------------
# Pure-JAX f32 reference
# ----------------------------------------------------------------------------
def reference_double_conv11(params, x_nchw):
    def conv(x, w, b, s):
        y = jax.lax.conv_general_dilated(
            x, w, window_strides=(s, s), padding=((1, 1), (1, 1)),
            dimension_numbers=("NHWC", "HWIO", "NHWC"))
        y = y + b
        return jnp.where(y > 0, y, 0.01 * y)

    (w1, b1), (w2, b2), (w3, b3) = params
    x = jnp.transpose(x_nchw, (0, 2, 3, 1))
    y = conv(x, w1, b1, 2)
    y = conv(y, w2, b2, 1)
    y = conv(y, w3, b3, 1)
    return jnp.transpose(y, (0, 3, 1, 2))


# ----------------------------------------------------------------------------
if __name__ == "__main__":
    key = jax.random.PRNGKey(0)
    kx, kw1, kb1, kw2, kb2, kw3, kb3 = jax.random.split(key, 7)

    Nb, Cin, H, W = 2, 4, 16, 16
    Cout = 8
    x = jax.random.normal(kx, (Nb, Cin, H, W), jnp.float32)

    def init_conv(k_w, k_b, cin, cout):
        w = jax.random.normal(k_w, (3, 3, cin, cout), jnp.float32) * (9 * cin) ** -0.5
        b = 0.01 * jax.random.normal(k_b, (cout,), jnp.float32)
        return w, b

    params = [init_conv(kw1, kb1, Cin, Cout),
              init_conv(kw2, kb2, Cout, Cout),
              init_conv(kw3, kb3, Cout, Cout)]

    fwd = jax.jit(double_conv11)
    y = jax.block_until_ready(fwd(params, x))

    assert y.shape == (Nb, Cout, H // 2, W // 2), y.shape
    assert bool(jnp.all(jnp.isfinite(y)))

    y_ref = reference_double_conv11(params, x)
    max_err = float(jnp.max(jnp.abs(y - y_ref)))
    assert max_err < 1e-1, f"max abs err {max_err}"   # bf16-operand tolerance

    print("KERNEL_OK")
</pallas_src>

<mosaic_0001>
module attributes {stable_mosaic.version = 11 : i64} {
  func.func @_mm_single_k_kernel(%arg0: i32, %arg1: i32, %arg2: memref<64x36xbf16, #tpu.memory_space<vmem>>, %arg3: memref<36x128xbf16, #tpu.memory_space<vmem>>, %arg4: memref<1x128xf32, #tpu.memory_space<vmem>>, %arg5: memref<64x128xbf16, #tpu.memory_space<vmem>>) attributes {dimension_semantics = [#tpu.dimension_semantics<parallel>, #tpu.dimension_semantics<parallel>], iteration_bounds = array<i64: 2, 1>, scalar_prefetch = 0 : i64, scratch_operands = 0 : i64, tpu.core_type = #tpu.core_type<tc>, window_params = [{transform_indices = @transform_0, window_bounds = array<i64: 64, 36>}, {transform_indices = @transform_1, window_bounds = array<i64: 36, 128>}, {transform_indices = @transform_2, window_bounds = array<i64: 1, 128>}, {transform_indices = @transform_3, window_bounds = array<i64: 64, 128>}]} {
    %c0 = arith.constant 0 : index
    %c0_0 = arith.constant 0 : index
    %0 = vector.load %arg2[%c0, %c0_0] : memref<64x36xbf16, #tpu.memory_space<vmem>>, vector<64x36xbf16>
    %c0_1 = arith.constant 0 : index
    %c0_2 = arith.constant 0 : index
    %1 = vector.load %arg3[%c0_1, %c0_2] : memref<36x128xbf16, #tpu.memory_space<vmem>>, vector<36x128xbf16>
    %cst = arith.constant dense<0.000000e+00> : vector<64x128xf32>
    %2 = tpu.matmul %0, %1, %cst {dimension_numbers = #tpu.dot_dimension_numbers<[1], [0], [0], [1], [0, 0, 1, 1], [], []>} : vector<64x36xbf16>, vector<36x128xbf16>, vector<64x128xf32> -> vector<64x128xf32>
    %c0_3 = arith.constant 0 : index
    %c0_4 = arith.constant 0 : index
    %3 = vector.load %arg4[%c0_3, %c0_4] : memref<1x128xf32, #tpu.memory_space<vmem>>, vector<1x128xf32>
    %4 = vector.broadcast %3 : vector<1x128xf32> to vector<64x128xf32>
    %5 = arith.addf %2, %4 : vector<64x128xf32>
    %cst_5 = arith.constant 0.000000e+00 : f32
    %6 = vector.broadcast %cst_5 : f32 to vector<64x128xf32>
    %7 = arith.cmpf ogt, %5, %6 : vector<64x128xf32>
    %cst_6 = arith.constant 0.00999999977 : f32
    %8 = vector.broadcast %cst_6 : f32 to vector<64x128xf32>
    %9 = arith.mulf %8, %5 : vector<64x128xf32>
    %10 = arith.select %7, %5, %9 : vector<64x128xi1>, vector<64x128xf32>
    %11 = arith.truncf %10 : vector<64x128xf32> to vector<64x128xbf16>
    %c0_7 = arith.constant 0 : index
    %c0_8 = arith.constant 0 : index
    %12 = vector.load %arg5[%c0_7, %c0_8] : memref<64x128xbf16, #tpu.memory_space<vmem>>, vector<64x128xbf16>
    tpu.vector_store %arg5[%c0_7, %c0_8], %11 {strides = array<i32>} : memref<64x128xbf16, #tpu.memory_space<vmem>>, vector<64x128xbf16>,
    return
  }
  func.func @transform_0(%arg0: i32, %arg1: i32) -> (i32, i32) {
    %c0_i32 = arith.constant 0 : i32
    %c0_i32_0 = arith.constant 0 : i32
    return %arg0, %c0_i32 : i32, i32
  }
  func.func @transform_1(%arg0: i32, %arg1: i32) -> (i32, i32) {
    %c0_i32 = arith.constant 0 : i32
    %c0_i32_0 = arith.constant 0 : i32
    return %c0_i32, %arg1 : i32, i32
  }
  func.func @transform_2(%arg0: i32, %arg1: i32) -> (i32, i32) {
    %c0_i32 = arith.constant 0 : i32
    %c0_i32_0 = arith.constant 0 : i32
    return %c0_i32, %arg1 : i32, i32
  }
  func.func @transform_3(%arg0: i32, %arg1: i32) -> (i32, i32) {
    %c0_i32 = arith.constant 0 : i32
    return %arg0, %arg1 : i32, i32
  }
}

module attributes {stable_mosaic.version = 11 : i64} {
  func.func @_conv3x3_s1_kernel(%arg0: i32, %arg1: i32, %arg2: memref<112x8xbf16, #tpu.memory_space<vmem>>, %arg3: memref<112x8xbf16, #tpu.memory_space<vmem>>, %arg4: memref<9x8x128xbf16, #tpu.memory_space<vmem>>, %arg5: memref<1x128xf32, #tpu.memory_space<vmem>>, %arg6: memref<112x128xbf16, #tpu.memory_space<vmem>>) attributes {dimension_semantics = [#tpu.dimension_semantics<parallel>, #tpu.dimension_semantics<parallel>], iteration_bounds = array<i64: 2, 1>, scalar_prefetch = 0 : i64, scratch_operands = 0 : i64, tpu.core_type = #tpu.core_type<tc>, window_params = [{transform_indices = @transform_0, window_bounds = array<i64: 112, 8>}, {transform_indices = @transform_1, window_bounds = array<i64: 112, 8>}, {transform_indices = @transform_2, window_bounds = array<i64: 9, 8, 128>}, {transform_indices = @transform_3, window_bounds = array<i64: 1, 128>}, {transform_indices = @transform_4, window_bounds = array<i64: 112, 128>}]} {
    %c0 = arith.constant 0 : index
    %c0_0 = arith.constant 0 : index
    %0 = vector.load %arg2[%c0, %c0_0] : memref<112x8xbf16, #tpu.memory_space<vmem>>, vector<112x8xbf16>
    %c0_1 = arith.constant 0 : index
    %c0_2 = arith.constant 0 : index
    %1 = vector.load %arg3[%c0_1, %c0_2] : memref<112x8xbf16, #tpu.memory_space<vmem>>, vector<112x8xbf16>
    %2 = tpu.concatenate %0, %1 in 0 : vector<112x8xbf16>, vector<112x8xbf16> -> vector<224x8xbf16>
    %3 = arith.extf %2 : vector<224x8xbf16> to vector<224x8xf32>
    %4 = vector.extract_strided_slice %3 {offsets = [0, 0], sizes = [112, 8], strides = [1, 1]} : vector<224x8xf32> to vector<112x8xf32>
    %c0_3 = arith.constant 0 : index
    %c0_4 = arith.constant 0 : index
    %c0_5 = arith.constant 0 : index
    %5 = vector.load %arg4[%c0_3, %c0_4, %c0_5] : memref<9x8x128xbf16, #tpu.memory_space<vmem>>, vector<1x8x128xbf16>
    %6 = vector.shape_cast %5 : vector<1x8x128xbf16> to vector<8x128xbf16>
    %7 = arith.extf %6 : vector<8x128xbf16> to vector<8x128xf32>
    %cst = arith.constant dense<0.000000e+00> : vector<112x128xf32>
    %8 = tpu.matmul %4, %7, %cst {dimension_numbers = #tpu.dot_dimension_numbers<[1], [0], [0], [1], [0, 0, 1, 1], [], []>} : vector<112x8xf32>, vector<8x128xf32>, vector<112x128xf32> -> vector<112x128xf32>
    %9 = vector.extract_strided_slice %3 {offsets = [1, 0], sizes = [112, 8], strides = [1, 1]} : vector<224x8xf32> to vector<112x8xf32>
    %c1 = arith.constant 1 : index
    %c0_6 = arith.constant 0 : index
    %c0_7 = arith.constant 0 : index
    %10 = vector.load %arg4[%c1, %c0_6, %c0_7] : memref<9x8x128xbf16, #tpu.memory_space<vmem>>, vector<1x8x128xbf16>
    %11 = vector.shape_cast %10 : vector<1x8x128xbf16> to vector<8x128xbf16>
    %12 = arith.extf %11 : vector<8x128xbf16> to vector<8x128xf32>
    %cst_8 = arith.constant dense<0.000000e+00> : vector<112x128xf32>
    %13 = tpu.matmul %9, %12, %cst_8 {dimension_numbers = #tpu.dot_dimension_numbers<[1], [0], [0], [1], [0, 0, 1, 1], [], []>} : vector<112x8xf32>, vector<8x128xf32>, vector<112x128xf32> -> vector<112x128xf32>
    %14 = arith.addf %8, %13 : vector<112x128xf32>
    %15 = vector.extract_strided_slice %3 {offsets = [2, 0], sizes = [112, 8], strides = [1, 1]} : vector<224x8xf32> to vector<112x8xf32>
    %c2 = arith.constant 2 : index
    %c0_9 = arith.constant 0 : index
    %c0_10 = arith.constant 0 : index
    %16 = vector.load %arg4[%c2, %c0_9, %c0_10] : memref<9x8x128xbf16, #tpu.memory_space<vmem>>, vector<1x8x128xbf16>
    %17 = vector.shape_cast %16 : vector<1x8x128xbf16> to vector<8x128xbf16>
    %18 = arith.extf %17 : vector<8x128xbf16> to vector<8x128xf32>
    %cst_11 = arith.constant dense<0.000000e+00> : vector<112x128xf32>
    %19 = tpu.matmul %15, %18, %cst_11 {dimension_numbers = #tpu.dot_dimension_numbers<[1], [0], [0], [1], [0, 0, 1, 1], [], []>} : vector<112x8xf32>, vector<8x128xf32>, vector<112x128xf32> -> vector<112x128xf32>
    %20 = arith.addf %14, %19 : vector<112x128xf32>
    %21 = vector.extract_strided_slice %3 {offsets = [10, 0], sizes = [112, 8], strides = [1, 1]} : vector<224x8xf32> to vector<112x8xf32>
    %c3 = arith.constant 3 : index
    %c0_12 = arith.constant 0 : index
    %c0_13 = arith.constant 0 : index
    %22 = vector.load %arg4[%c3, %c0_12, %c0_13] : memref<9x8x128xbf16, #tpu.memory_space<vmem>>, vector<1x8x128xbf16>
    %23 = vector.shape_cast %22 : vector<1x8x128xbf16> to vector<8x128xbf16>
    %24 = arith.extf %23 : vector<8x128xbf16> to vector<8x128xf32>
    %cst_14 = arith.constant dense<0.000000e+00> : vector<112x128xf32>
    %25 = tpu.matmul %21, %24, %cst_14 {dimension_numbers = #tpu.dot_dimension_numbers<[1], [0], [0], [1], [0, 0, 1, 1], [], []>} : vector<112x8xf32>, vector<8x128xf32>, vector<112x128xf32> -> vector<112x128xf32>
    %26 = arith.addf %20, %25 : vector<112x128xf32>
    %27 = vector.extract_strided_slice %3 {offsets = [11, 0], sizes = [112, 8], strides = [1, 1]} : vector<224x8xf32> to vector<112x8xf32>
    %c4 = arith.constant 4 : index
    %c0_15 = arith.constant 0 : index
    %c0_16 = arith.constant 0 : index
    %28 = vector.load %arg4[%c4, %c0_15, %c0_16] : memref<9x8x128xbf16, #tpu.memory_space<vmem>>, vector<1x8x128xbf16>
    %29 = vector.shape_cast %28 : vector<1x8x128xbf16> to vector<8x128xbf16>
    %30 = arith.extf %29 : vector<8x128xbf16> to vector<8x128xf32>
    %cst_17 = arith.constant dense<0.000000e+00> : vector<112x128xf32>
    %31 = tpu.matmul %27, %30, %cst_17 {dimension_numbers = #tpu.dot_dimension_numbers<[1], [0], [0], [1], [0, 0, 1, 1], [], []>} : vector<112x8xf32>, vector<8x128xf32>, vector<112x128xf32> -> vector<112x128xf32>
    %32 = arith.addf %26, %31 : vector<112x128xf32>
    %33 = vector.extract_strided_slice %3 {offsets = [12, 0], sizes = [112, 8], strides = [1, 1]} : vector<224x8xf32> to vector<112x8xf32>
    %c5 = arith.constant 5 : index
    %c0_18 = arith.constant 0 : index
    %c0_19 = arith.constant 0 : index
    %34 = vector.load %arg4[%c5, %c0_18, %c0_19] : memref<9x8x128xbf16, #tpu.memory_space<vmem>>, vector<1x8x128xbf16>
    %35 = vector.shape_cast %34 : vector<1x8x128xbf16> to vector<8x128xbf16>
    %36 = arith.extf %35 : vector<8x128xbf16> to vector<8x128xf32>
    %cst_20 = arith.constant dense<0.000000e+00> : vector<112x128xf32>
    %37 = tpu.matmul %33, %36, %cst_20 {dimension_numbers = #tpu.dot_dimension_numbers<[1], [0], [0], [1], [0, 0, 1, 1], [], []>} : vector<112x8xf32>, vector<8x128xf32>, vector<112x128xf32> -> vector<112x128xf32>
    %38 = arith.addf %32, %37 : vector<112x128xf32>
    %39 = vector.extract_strided_slice %3 {offsets = [20, 0], sizes = [112, 8], strides = [1, 1]} : vector<224x8xf32> to vector<112x8xf32>
    %c6 = arith.constant 6 : index
    %c0_21 = arith.constant 0 : index
    %c0_22 = arith.constant 0 : index
    %40 = vector.load %arg4[%c6, %c0_21, %c0_22] : memref<9x8x128xbf16, #tpu.memory_space<vmem>>, vector<1x8x128xbf16>
    %41 = vector.shape_cast %40 : vector<1x8x128xbf16> to vector<8x128xbf16>
    %42 = arith.extf %41 : vector<8x128xbf16> to vector<8x128xf32>
    %cst_23 = arith.constant dense<0.000000e+00> : vector<112x128xf32>
    %43 = tpu.matmul %39, %42, %cst_23 {dimension_numbers = #tpu.dot_dimension_numbers<[1], [0], [0], [1], [0, 0, 1, 1], [], []>} : vector<112x8xf32>, vector<8x128xf32>, vector<112x128xf32> -> vector<112x128xf32>
    %44 = arith.addf %38, %43 : vector<112x128xf32>
    %45 = vector.extract_strided_slice %3 {offsets = [21, 0], sizes = [112, 8], strides = [1, 1]} : vector<224x8xf32> to vector<112x8xf32>
    %c7 = arith.constant 7 : index
    %c0_24 = arith.constant 0 : index
    %c0_25 = arith.constant 0 : index
    %46 = vector.load %arg4[%c7, %c0_24, %c0_25] : memref<9x8x128xbf16, #tpu.memory_space<vmem>>, vector<1x8x128xbf16>
    %47 = vector.shape_cast %46 : vector<1x8x128xbf16> to vector<8x128xbf16>
    %48 = arith.extf %47 : vector<8x128xbf16> to vector<8x128xf32>
    %cst_26 = arith.constant dense<0.000000e+00> : vector<112x128xf32>
    %49 = tpu.matmul %45, %48, %cst_26 {dimension_numbers = #tpu.dot_dimension_numbers<[1], [0], [0], [1], [0, 0, 1, 1], [], []>} : vector<112x8xf32>, vector<8x128xf32>, vector<112x128xf32> -> vector<112x128xf32>
    %50 = arith.addf %44, %49 : vector<112x128xf32>
    %51 = vector.extract_strided_slice %3 {offsets = [22, 0], sizes = [112, 8], strides = [1, 1]} : vector<224x8xf32> to vector<112x8xf32>
    %c8 = arith.constant 8 : index
    %c0_27 = arith.constant 0 : index
    %c0_28 = arith.constant 0 : index
    %52 = vector.load %arg4[%c8, %c0_27, %c0_28] : memref<9x8x128xbf16, #tpu.memory_space<vmem>>, vector<1x8x128xbf16>
    %53 = vector.shape_cast %52 : vector<1x8x128xbf16> to vector<8x128xbf16>
    %54 = arith.extf %53 : vector<8x128xbf16> to vector<8x128xf32>
    %cst_29 = arith.constant dense<0.000000e+00> : vector<112x128xf32>
    %55 = tpu.matmul %51, %54, %cst_29 {dimension_numbers = #tpu.dot_dimension_numbers<[1], [0], [0], [1], [0, 0, 1, 1], [], []>} : vector<112x8xf32>, vector<8x128xf32>, vector<112x128xf32> -> vector<112x128xf32>
    %56 = arith.addf %50, %55 : vector<112x128xf32>
    %c0_30 = arith.constant 0 : index
    %c0_31 = arith.constant 0 : index
    %57 = vector.load %arg5[%c0_30, %c0_31] : memref<1x128xf32, #tpu.memory_space<vmem>>, vector<1x128xf32>
    %58 = vector.broadcast %57 : vector<1x128xf32> to vector<112x128xf32>
    %59 = arith.addf %56, %58 : vector<112x128xf32>
    %cst_32 = arith.constant 0.000000e+00 : f32
    %60 = vector.broadcast %cst_32 : f32 to vector<112x128xf32>
    %61 = arith.cmpf ogt, %59, %60 : vector<112x128xf32>
    %cst_33 = arith.constant 0.00999999977 : f32
    %62 = vector.broadcast %cst_33 : f32 to vector<112x128xf32>
    %63 = arith.mulf %62, %59 : vector<112x128xf32>
    %64 = arith.select %61, %59, %63 : vector<112x128xi1>, vector<112x128xf32>
    %65 = arith.truncf %64 : vector<112x128xf32> to vector<112x128xbf16>
    %c0_34 = arith.constant 0 : index
    %c0_35 = arith.constant 0 : index
    %66 = vector.load %arg6[%c0_34, %c0_35] : memref<112x128xbf16, #tpu.memory_space<vmem>>, vector<112x128xbf16>
    tpu.vector_store %arg6[%c0_34, %c0_35], %65 {strides = array<i32>} : memref<112x128xbf16, #tpu.memory_space<vmem>>, vector<112x128xbf16>,
    return
  }
  func.func @transform_0(%arg0: i32, %arg1: i32) -> (i32, i32) {
    %c0_i32 = arith.constant 0 : i32
    %c0_i32_0 = arith.constant 0 : i32
    return %arg0, %c0_i32 : i32, i32
  }
  func.func @transform_1(%arg0: i32, %arg1: i32) -> (i32, i32) {
    %c1_i32 = arith.constant 1 : i32
    %0 = arith.addi %arg0, %c1_i32 : i32
    %c0_i32 = arith.constant 0 : i32
    %c0_i32_0 = arith.constant 0 : i32
    return %0, %c0_i32 : i32, i32
  }
  func.func @transform_2(%arg0: i32, %arg1: i32) -> (i32, i32, i32) {
    %c0_i32 = arith.constant 0 : i32
    %c0_i32_0 = arith.constant 0 : i32
    %c0_i32_1 = arith.constant 0 : i32
    return %c0_i32, %c0_i32_0, %arg1 : i32, i32, i32
  }
  func.func @transform_3(%arg0: i32, %arg1: i32) -> (i32, i32) {
    %c0_i32 = arith.constant 0 : i32
    %c0_i32_0 = arith.constant 0 : i32
    return %c0_i32, %arg1 : i32, i32
  }
  func.func @transform_4(%arg0: i32, %arg1: i32) -> (i32, i32) {
    %c0_i32 = arith.constant 0 : i32
    return %arg0, %arg1 : i32, i32
  }
}

module attributes {stable_mosaic.version = 11 : i64} {
  func.func @_conv3x3_s1_kernel(%arg0: i32, %arg1: i32, %arg2: memref<112x8xbf16, #tpu.memory_space<vmem>>, %arg3: memref<112x8xbf16, #tpu.memory_space<vmem>>, %arg4: memref<9x8x128xbf16, #tpu.memory_space<vmem>>, %arg5: memref<1x128xf32, #tpu.memory_space<vmem>>, %arg6: memref<112x128xf32, #tpu.memory_space<vmem>>) attributes {dimension_semantics = [#tpu.dimension_semantics<parallel>, #tpu.dimension_semantics<parallel>], iteration_bounds = array<i64: 2, 1>, scalar_prefetch = 0 : i64, scratch_operands = 0 : i64, tpu.core_type = #tpu.core_type<tc>, window_params = [{transform_indices = @transform_0, window_bounds = array<i64: 112, 8>}, {transform_indices = @transform_1, window_bounds = array<i64: 112, 8>}, {transform_indices = @transform_2, window_bounds = array<i64: 9, 8, 128>}, {transform_indices = @transform_3, window_bounds = array<i64: 1, 128>}, {transform_indices = @transform_4, window_bounds = array<i64: 112, 128>}]} {
    %c0 = arith.constant 0 : index
    %c0_0 = arith.constant 0 : index
    %0 = vector.load %arg2[%c0, %c0_0] : memref<112x8xbf16, #tpu.memory_space<vmem>>, vector<112x8xbf16>
    %c0_1 = arith.constant 0 : index
    %c0_2 = arith.constant 0 : index
    %1 = vector.load %arg3[%c0_1, %c0_2] : memref<112x8xbf16, #tpu.memory_space<vmem>>, vector<112x8xbf16>
    %2 = tpu.concatenate %0, %1 in 0 : vector<112x8xbf16>, vector<112x8xbf16> -> vector<224x8xbf16>
    %3 = arith.extf %2 : vector<224x8xbf16> to vector<224x8xf32>
    %4 = vector.extract_strided_slice %3 {offsets = [0, 0], sizes = [112, 8], strides = [1, 1]} : vector<224x8xf32> to vector<112x8xf32>
    %c0_3 = arith.constant 0 : index
    %c0_4 = arith.constant 0 : index
    %c0_5 = arith.constant 0 : index
    %5 = vector.load %arg4[%c0_3, %c0_4, %c0_5] : memref<9x8x128xbf16, #tpu.memory_space<vmem>>, vector<1x8x128xbf16>
    %6 = vector.shape_cast %5 : vector<1x8x128xbf16> to vector<8x128xbf16>
    %7 = arith.extf %6 : vector<8x128xbf16> to vector<8x128xf32>
    %cst = arith.constant dense<0.000000e+00> : vector<112x128xf32>
    %8 = tpu.matmul %4, %7, %cst {dimension_numbers = #tpu.dot_dimension_numbers<[1], [0], [0], [1], [0, 0, 1, 1], [], []>} : vector<112x8xf32>, vector<8x128xf32>, vector<112x128xf32> -> vector<112x128xf32>
    %9 = vector.extract_strided_slice %3 {offsets = [1, 0], sizes = [112, 8], strides = [1, 1]} : vector<224x8xf32> to vector<112x8xf32>
    %c1 = arith.constant 1 : index
    %c0_6 = arith.constant 0 : index
    %c0_7 = arith.constant 0 : index
    %10 = vector.load %arg4[%c1, %c0_6, %c0_7] : memref<9x8x128xbf16, #tpu.memory_space<vmem>>, vector<1x8x128xbf16>
    %11 = vector.shape_cast %10 : vector<1x8x128xbf16> to vector<8x128xbf16>
    %12 = arith.extf %11 : vector<8x128xbf16> to vector<8x128xf32>
    %cst_8 = arith.constant dense<0.000000e+00> : vector<112x128xf32>
    %13 = tpu.matmul %9, %12, %cst_8 {dimension_numbers = #tpu.dot_dimension_numbers<[1], [0], [0], [1], [0, 0, 1, 1], [], []>} : vector<112x8xf32>, vector<8x128xf32>, vector<112x128xf32> -> vector<112x128xf32>
    %14 = arith.addf %8, %13 : vector<112x128xf32>
    %15 = vector.extract_strided_slice %3 {offsets = [2, 0], sizes = [112, 8], strides = [1, 1]} : vector<224x8xf32> to vector<112x8xf32>
    %c2 = arith.constant 2 : index
    %c0_9 = arith.constant 0 : index
    %c0_10 = arith.constant 0 : index
    %16 = vector.load %arg4[%c2, %c0_9, %c0_10] : memref<9x8x128xbf16, #tpu.memory_space<vmem>>, vector<1x8x128xbf16>
    %17 = vector.shape_cast %16 : vector<1x8x128xbf16> to vector<8x128xbf16>
    %18 = arith.extf %17 : vector<8x128xbf16> to vector<8x128xf32>
    %cst_11 = arith.constant dense<0.000000e+00> : vector<112x128xf32>
    %19 = tpu.matmul %15, %18, %cst_11 {dimension_numbers = #tpu.dot_dimension_numbers<[1], [0], [0], [1], [0, 0, 1, 1], [], []>} : vector<112x8xf32>, vector<8x128xf32>, vector<112x128xf32> -> vector<112x128xf32>
    %20 = arith.addf %14, %19 : vector<112x128xf32>
    %21 = vector.extract_strided_slice %3 {offsets = [10, 0], sizes = [112, 8], strides = [1, 1]} : vector<224x8xf32> to vector<112x8xf32>
    %c3 = arith.constant 3 : index
    %c0_12 = arith.constant 0 : index
    %c0_13 = arith.constant 0 : index
    %22 = vector.load %arg4[%c3, %c0_12, %c0_13] : memref<9x8x128xbf16, #tpu.memory_space<vmem>>, vector<1x8x128xbf16>
    %23 = vector.shape_cast %22 : vector<1x8x128xbf16> to vector<8x128xbf16>
    %24 = arith.extf %23 : vector<8x128xbf16> to vector<8x128xf32>
    %cst_14 = arith.constant dense<0.000000e+00> : vector<112x128xf32>
    %25 = tpu.matmul %21, %24, %cst_14 {dimension_numbers = #tpu.dot_dimension_numbers<[1], [0], [0], [1], [0, 0, 1, 1], [], []>} : vector<112x8xf32>, vector<8x128xf32>, vector<112x128xf32> -> vector<112x128xf32>
    %26 = arith.addf %20, %25 : vector<112x128xf32>
    %27 = vector.extract_strided_slice %3 {offsets = [11, 0], sizes = [112, 8], strides = [1, 1]} : vector<224x8xf32> to vector<112x8xf32>
    %c4 = arith.constant 4 : index
    %c0_15 = arith.constant 0 : index
    %c0_16 = arith.constant 0 : index
    %28 = vector.load %arg4[%c4, %c0_15, %c0_16] : memref<9x8x128xbf16, #tpu.memory_space<vmem>>, vector<1x8x128xbf16>
    %29 = vector.shape_cast %28 : vector<1x8x128xbf16> to vector<8x128xbf16>
    %30 = arith.extf %29 : vector<8x128xbf16> to vector<8x128xf32>
    %cst_17 = arith.constant dense<0.000000e+00> : vector<112x128xf32>
    %31 = tpu.matmul %27, %30, %cst_17 {dimension_numbers = #tpu.dot_dimension_numbers<[1], [0], [0], [1], [0, 0, 1, 1], [], []>} : vector<112x8xf32>, vector<8x128xf32>, vector<112x128xf32> -> vector<112x128xf32>
    %32 = arith.addf %26, %31 : vector<112x128xf32>
    %33 = vector.extract_strided_slice %3 {offsets = [12, 0], sizes = [112, 8], strides = [1, 1]} : vector<224x8xf32> to vector<112x8xf32>
    %c5 = arith.constant 5 : index
    %c0_18 = arith.constant 0 : index
    %c0_19 = arith.constant 0 : index
    %34 = vector.load %arg4[%c5, %c0_18, %c0_19] : memref<9x8x128xbf16, #tpu.memory_space<vmem>>, vector<1x8x128xbf16>
    %35 = vector.shape_cast %34 : vector<1x8x128xbf16> to vector<8x128xbf16>
    %36 = arith.extf %35 : vector<8x128xbf16> to vector<8x128xf32>
    %cst_20 = arith.constant dense<0.000000e+00> : vector<112x128xf32>
    %37 = tpu.matmul %33, %36, %cst_20 {dimension_numbers = #tpu.dot_dimension_numbers<[1], [0], [0], [1], [0, 0, 1, 1], [], []>} : vector<112x8xf32>, vector<8x128xf32>, vector<112x128xf32> -> vector<112x128xf32>
    %38 = arith.addf %32, %37 : vector<112x128xf32>
    %39 = vector.extract_strided_slice %3 {offsets = [20, 0], sizes = [112, 8], strides = [1, 1]} : vector<224x8xf32> to vector<112x8xf32>
    %c6 = arith.constant 6 : index
    %c0_21 = arith.constant 0 : index
    %c0_22 = arith.constant 0 : index
    %40 = vector.load %arg4[%c6, %c0_21, %c0_22] : memref<9x8x128xbf16, #tpu.memory_space<vmem>>, vector<1x8x128xbf16>
    %41 = vector.shape_cast %40 : vector<1x8x128xbf16> to vector<8x128xbf16>
    %42 = arith.extf %41 : vector<8x128xbf16> to vector<8x128xf32>
    %cst_23 = arith.constant dense<0.000000e+00> : vector<112x128xf32>
    %43 = tpu.matmul %39, %42, %cst_23 {dimension_numbers = #tpu.dot_dimension_numbers<[1], [0], [0], [1], [0, 0, 1, 1], [], []>} : vector<112x8xf32>, vector<8x128xf32>, vector<112x128xf32> -> vector<112x128xf32>
    %44 = arith.addf %38, %43 : vector<112x128xf32>
    %45 = vector.extract_strided_slice %3 {offsets = [21, 0], sizes = [112, 8], strides = [1, 1]} : vector<224x8xf32> to vector<112x8xf32>
    %c7 = arith.constant 7 : index
    %c0_24 = arith.constant 0 : index
    %c0_25 = arith.constant 0 : index
    %46 = vector.load %arg4[%c7, %c0_24, %c0_25] : memref<9x8x128xbf16, #tpu.memory_space<vmem>>, vector<1x8x128xbf16>
    %47 = vector.shape_cast %46 : vector<1x8x128xbf16> to vector<8x128xbf16>
    %48 = arith.extf %47 : vector<8x128xbf16> to vector<8x128xf32>
    %cst_26 = arith.constant dense<0.000000e+00> : vector<112x128xf32>
    %49 = tpu.matmul %45, %48, %cst_26 {dimension_numbers = #tpu.dot_dimension_numbers<[1], [0], [0], [1], [0, 0, 1, 1], [], []>} : vector<112x8xf32>, vector<8x128xf32>, vector<112x128xf32> -> vector<112x128xf32>
    %50 = arith.addf %44, %49 : vector<112x128xf32>
    %51 = vector.extract_strided_slice %3 {offsets = [22, 0], sizes = [112, 8], strides = [1, 1]} : vector<224x8xf32> to vector<112x8xf32>
    %c8 = arith.constant 8 : index
    %c0_27 = arith.constant 0 : index
    %c0_28 = arith.constant 0 : index
    %52 = vector.load %arg4[%c8, %c0_27, %c0_28] : memref<9x8x128xbf16, #tpu.memory_space<vmem>>, vector<1x8x128xbf16>
    %53 = vector.shape_cast %52 : vector<1x8x128xbf16> to vector<8x128xbf16>
    %54 = arith.extf %53 : vector<8x128xbf16> to vector<8x128xf32>
    %cst_29 = arith.constant dense<0.000000e+00> : vector<112x128xf32>
    %55 = tpu.matmul %51, %54, %cst_29 {dimension_numbers = #tpu.dot_dimension_numbers<[1], [0], [0], [1], [0, 0, 1, 1], [], []>} : vector<112x8xf32>, vector<8x128xf32>, vector<112x128xf32> -> vector<112x128xf32>
    %56 = arith.addf %50, %55 : vector<112x128xf32>
    %c0_30 = arith.constant 0 : index
    %c0_31 = arith.constant 0 : index
    %57 = vector.load %arg5[%c0_30, %c0_31] : memref<1x128xf32, #tpu.memory_space<vmem>>, vector<1x128xf32>
    %58 = vector.broadcast %57 : vector<1x128xf32> to vector<112x128xf32>
    %59 = arith.addf %56, %58 : vector<112x128xf32>
    %cst_32 = arith.constant 0.000000e+00 : f32
    %60 = vector.broadcast %cst_32 : f32 to vector<112x128xf32>
    %61 = arith.cmpf ogt, %59, %60 : vector<112x128xf32>
    %cst_33 = arith.constant 0.00999999977 : f32
    %62 = vector.broadcast %cst_33 : f32 to vector<112x128xf32>
    %63 = arith.mulf %62, %59 : vector<112x128xf32>
    %64 = arith.select %61, %59, %63 : vector<112x128xi1>, vector<112x128xf32>
    %c0_34 = arith.constant 0 : index
    %c0_35 = arith.constant 0 : index
    %65 = vector.load %arg6[%c0_34, %c0_35] : memref<112x128xf32, #tpu.memory_space<vmem>>, vector<112x128xf32>
    tpu.vector_store %arg6[%c0_34, %c0_35], %64 {strides = array<i32>} : memref<112x128xf32, #tpu.memory_space<vmem>>, vector<112x128xf32>,
    return
  }
  func.func @transform_0(%arg0: i32, %arg1: i32) -> (i32, i32) {
    %c0_i32 = arith.constant 0 : i32
    %c0_i32_0 = arith.constant 0 : i32
    return %arg0, %c0_i32 : i32, i32
  }
  func.func @transform_1(%arg0: i32, %arg1: i32) -> (i32, i32) {
    %c1_i32 = arith.constant 1 : i32
    %0 = arith.addi %arg0, %c1_i32 : i32
    %c0_i32 = arith.constant 0 : i32
    %c0_i32_0 = arith.constant 0 : i32
    return %0, %c0_i32 : i32, i32
  }
  func.func @transform_2(%arg0: i32, %arg1: i32) -> (i32, i32, i32) {
    %c0_i32 = arith.constant 0 : i32
    %c0_i32_0 = arith.constant 0 : i32
    %c0_i32_1 = arith.constant 0 : i32
    return %c0_i32, %c0_i32_0, %arg1 : i32, i32, i32
  }
  func.func @transform_3(%arg0: i32, %arg1: i32) -> (i32, i32) {
    %c0_i32 = arith.constant 0 : i32
    %c0_i32_0 = arith.constant 0 : i32
    return %c0_i32, %arg1 : i32, i32
  }
  func.func @transform_4(%arg0: i32, %arg1: i32) -> (i32, i32) {
    %c0_i32 = arith.constant 0 : i32
    return %arg0, %arg1 : i32, i32
  }
}

</mosaic_0001>

<bundles_post_ra>
// kernel: double_conv11.3
= control target key start
LH: loop header
LB: loop body
LE: loop exit
PB: predicated region body
PF: predicated region fallthrough
CT: control target
= control target key end

     0   :  { %s697_s12 = smov 0   ;;  %s699_s13 = smov 0   ;;  %s751_s0 = inlined_call_operand.vmem [shape: bf16[128,36], index: 0, kind: input, shape index: {}]   ;;  %s752_s1 = inlined_call_operand.vmem [shape: bf16[36,128], index: 1, kind: input, shape index: {}]   ;;  %s753_s2 = inlined_call_operand.vmem [shape: f32[1,128], index: 2, kind: input, shape index: {}]   ;;  %s754_s3 = inlined_call_operand.vmem [shape: bf16[128,128], index: 3, kind: output, shape index: {}]  }
   0x1   :  { %s701_s14 = smov 0  }
   0x2 LB: > { %s25_s15 = sadd.s32 1, %s671_s13  ;;  %p535_p0 = scmp.ge.s32.totalorder %s675_s14, 1  ;;  %s675_s14 = sphi %s701_s14, %s13_s14   ;;  %s671_s13 = sphi %s699_s13, %s756_s13   ;;  %s667_s12 = sphi %s697_s12, %s755_s12  }
   0x3   : > { %p27_p1 = scmp.ge.s32.totalorder %s25_s15, 2  ;;  %p169_p2 = scmp.lt.s32.totalorder %s675_s14, 3 }
   0x5   : > { %s758_s15 = smov (%p27_p1, %s25_s15), 0  ;;  %p170_p3 = pnand %p535_p0, %p169_p2 }
   0x6   : > { %v646_v0 = vld [vmem:[%s752_s1] sm:$0xff] (!%p170_p3)   ;;  %v647_v1 = vld [vmem:[%s752_s1 + $0x8] sm:$0xff] (!%p170_p3)   ;;  %s536_s20 = sshll.u32 (!%p170_p3), %s667_s12, 3  ;;  %v648_v2 = vld [vmem:[%s752_s1 + $0x10] ss:$0 sps:$4 sm:$0x33] (!%p170_p3)  }
   0x7   : > { %173 = sbr.rel (%p170_p3) target bundleno = 244 (0xf4), region = 32  ;;  %600 = vmatprep.subr.bf16.mxu0 (!%p170_p3), %v646_v0  ;;  %614 = vmatprep.subr.bf16.mxu1 (!%p170_p3), %v646_v0  ;;  %p204_p4 = scmp.lt.s32.totalorder (!%p170_p3), %s536_s20, 15  ;;  %vm294_vm0 = vcmask (!%p170_p3), 1041408   ;;  %vm281_vm1 = vcmask (!%p170_p3), 293888   ;;  %v540_v8 = vld [vmem:[%s753_s2] ss:$0 sm:$0xff] (!%p170_p3) }
   0x8   : > { %601 = vmatpush3.bf16.msra.mxu0 (!%p170_p3), %v646_v0  ;;  %617 = vmatpush3.bf16.msra.mxu1 (!%p170_p3), %v646_v0  ;;  %v296_v3 = vsel (!%p170_p3), %vm294_vm0, %v648_v2, 0 }
   0x9   : > { %602 = vmatprep.subr.bf16.mxu0 (!%p170_p3), %v647_v1  ;;  %615 = vmatprep.subr.bf16.mxu1 (!%p170_p3), %v647_v1 }
   0xc   : > { %603 = vmatpush3.bf16.msra.mxu0 (!%p170_p3), %v647_v1  ;;  %618 = vmatpush3.bf16.msra.mxu1 (!%p170_p3), %v647_v1 }
   0xd   : > { %620 = vmatprep.subr.msk.bf16.mxu0 (!%p170_p3), %vm294_vm0, %v648_v2  ;;  %621 = vmatprep.subr.msk.bf16.mxu1 (!%p170_p3), %vm294_vm0, %v648_v2 }
   0xe   : > { %s760_s20 = smov (!%p204_p4, %s536_s20), 15 }
   0xf   : > { %s537_s23 = sshll.u32 %s760_s20, 2 }
  0x10   : > { %s207_s26 = scalar_lea.vmem %s751_s0, %s537_s23  ;;  %605 = vmatpush3.bf16.msra.mxu0 %v296_v3  ;;  %619 = vmatpush3.bf16.msra.mxu1 %v296_v3  ;;  %s223_s4 = scalar_lea.vmem %s754_s3, %s537_s23 }
  0x11   : > { %v649_v4 = vld [vmem:[%s207_s26] sm:$0xff]   ;;  %v650_v5 = vld [vmem:[%s207_s26 + $0x10] sm:$0xff]   ;;  %v651_v6 = vld [vmem:[%s207_s26 + $0x8] sm:$0xff]  }
  0x12   : > { %606 = vmatprep.mubr.msk.bf16.mxu0 %vm281_vm1, %v649_v4  ;;  %v652_v7 = vld [vmem:[%s207_s26 + $0x18] sm:$0xff]   ;;  %610 = vmatprep.mubr.msk.bf16.mxu1 %vm281_vm1, %v650_v5 }
  0x13   : > { %607 = vmatmul.mubr.msk.bf16.vlgmr.msra.gmra.mrb[0].mxu0 %vm281_vm1, %v651_v6  ;;  %611 = vmatmul.mubr.msk.bf16.vlgmr.msra.gmra.mrb[0].mxu1 %vm281_vm1, %v652_v7 }
  0xe6   : > { %v608_v9 = vpop.f32.mrb[0].mxu0  ;;  %v612_v10 = vpop.f32.mrb[0].mxu1 }
  0xe7   : > { %v341_v11 = vadd.f32 %v608_v9, %v540_v8  ;;  %v357_v12 = vadd.f32 %v612_v10, %v540_v8  ;;  %v332_v13 = vpop.f32.mrb[1].mxu0  ;;  %v348_v14 = vpop.f32.mrb[1].mxu1 }
  0xe8   : > { %v333_v15 = vadd.f32 %v540_v8, %v332_v13  ;;  %v349_v16 = vadd.f32 %v540_v8, %v348_v14  ;;  %v609_v17 = vpop.f32.mrb[2].mxu0  ;;  %v613_v18 = vpop.f32.mrb[2].mxu1 }
  0xe9   : > { %vm365_vm2 = vcmp.gt.f32.partialorder %v341_v11, 0.0  ;;  %v373_v19 = vmul.f32 0.01, %v341_v11  ;;  %vm369_vm3 = vcmp.gt.f32.partialorder %v357_v12, 0.0  ;;  %v377_v20 = vmul.f32 0.01, %v357_v12 }
  0xea   : > { %vm363_vm4 = vcmp.gt.f32.partialorder %v333_v15, 0.0  ;;  %v371_v21 = vmul.f32 0.01, %v333_v15  ;;  %vm367_vm5 = vcmp.gt.f32.partialorder %v349_v16, 0.0  ;;  %v375_v22 = vmul.f32 0.01, %v349_v16 }
  0xeb   : > { %v344_v23 = vadd.f32 %v609_v17, %v540_v8  ;;  %v360_v24 = vadd.f32 %v613_v18, %v540_v8  ;;  %v335_v25 = vpop.f32.mrb[3].mxu0  ;;  %v351_v26 = vpop.f32.mrb[3].mxu1  ;;  %v381_v27 = vsel %vm365_vm2, %v341_v11, %v373_v19  ;;  %v385_v28 = vsel %vm369_vm3, %v357_v12, %v377_v20 }
  0xec   : > { %v336_v29 = vadd.f32 %v540_v8, %v335_v25  ;;  %v352_v30 = vadd.f32 %v540_v8, %v351_v26  ;;  %v379_v35 = vsel %vm363_vm4, %v333_v15, %v371_v21  ;;  %v383_v36 = vsel %vm367_vm5, %v349_v16, %v375_v22 }
  0xed   : > { %vm366_vm6 = vcmp.gt.f32.partialorder %v344_v23, 0.0  ;;  %v374_v31 = vmul.f32 0.01, %v344_v23  ;;  %vm370_vm7 = vcmp.gt.f32.partialorder %v360_v24, 0.0  ;;  %v378_v32 = vmul.f32 0.01, %v360_v24 }
  0xee   : > { %vm364_vm8 = vcmp.gt.f32.partialorder %v336_v29, 0.0  ;;  %v372_v33 = vmul.f32 0.01, %v336_v29  ;;  %vm368_vm9 = vcmp.gt.f32.partialorder %v352_v30, 0.0  ;;  %v376_v34 = vmul.f32 0.01, %v352_v30 }
  0xef   : > { %v382_v37 = vsel %vm366_vm6, %v344_v23, %v374_v31  ;;  %v386_v38 = vsel %vm370_vm7, %v360_v24, %v378_v32 }
  0xf0   : > { %v578_v39 = vpack.c.bf16 %v382_v37, %v381_v27  ;;  %v588_v40 = vpack.c.bf16 %v386_v38, %v385_v28  ;;  %v380_v41 = vsel %vm364_vm8, %v336_v29, %v372_v33  ;;  %v384_v42 = vsel %vm368_vm9, %v352_v30, %v376_v34 }
  0xf1   : > { %v573_v43 = vpack.c.bf16 %v380_v41, %v379_v35  ;;  %v583_v44 = vpack.c.bf16 %v384_v42, %v383_v36 }
  0xf2   : > { %590 = vst [vmem:[%s223_s4 + $0x8] sm:$0xff] %v578_v39   ;;  %592 = vst [vmem:[%s223_s4 + $0x18] sm:$0xff] %v588_v40  }
  0xf3   : > { %574 = vst [vmem:[%s223_s4] sm:$0xff] %v573_v43   ;;  %591 = vst [vmem:[%s223_s4 + $0x10] sm:$0xff] %v583_v44  }
  0xf4 PF: > { %s13_s14 = sadd.s32 1, %s675_s14   ;;  %s755_s12 = smov %s671_s13 }
  0xf5   : > { %p10_p5 = scmp.ge.s32.totalorder %s13_s14, 4   ;;  %s756_s13 = smov %s758_s15 }
  0xf7   :  { %12 = sbr.rel (!%p10_p5) target bundleno = 2 (0x2), region = 68 }

// kernel: double_conv11.4
= control target key start
LH: loop header
LB: loop body
LE: loop exit
PB: predicated region body
PF: predicated region fallthrough
CT: control target
= control target key end

     0   :  { %s3125_s15 = smov 0   ;;  %s3127_s16 = smov 0   ;;  %s3792_s0 = inlined_call_operand.vmem [shape: bf16[336,8], index: 0, kind: input, shape index: {}, may-alias: {0,1}]   ;;  %s3793_s1 = inlined_call_operand.vmem [shape: bf16[336,8], index: 1, kind: input, shape index: {}, may-alias: {0,1}]   ;;  %s3794_s2 = inlined_call_operand.vmem [shape: bf16[9,8,128], index: 2, kind: input, shape index: {}]   ;;  %s3795_s3 = inlined_call_operand.vmem [shape: f32[1,128], index: 3, kind: input, shape index: {}]   ;;  %s3796_s4 = inlined_call_operand.vmem [shape: bf16[224,128], index: 4, kind: output, shape index: {}]  }
   0x1   :  { %s3129_s17 = smov 0  }
   0x2 LB: > { %s26_s18 = sadd.s32 1, %s3094_s16  ;;  %p2364_p0 = scmp.ge.s32.totalorder %s3098_s17, 1  ;;  %s3098_s17 = sphi %s3129_s17, %s14_s17   ;;  %s3094_s16 = sphi %s3127_s16, %s3818_s16   ;;  %s3090_s15 = sphi %s3125_s15, %s3817_s15  }
   0x3   : > { %p28_p1 = scmp.ge.s32.totalorder %s26_s18, 2  ;;  %p209_p2 = scmp.lt.s32.totalorder %s3098_s17, 3 }
   0x5   : > { %s3820_s18 = smov (%p28_p1, %s26_s18), 0  ;;  %p210_p3 = pnand %p2364_p0, %p209_p2 }
   0x7   : > { %213 = sbr.rel (%p210_p3) target bundleno = 376 (0x178), region = 36 }
   0xe   : > { %v3146_v0 = vld [vmem:[%s3794_s2 + $0x10] sm:$0xff]   ;;  %v3151_v1 = vld [vmem:[%s3794_s2] sm:$0xff]   ;;  %s3153_s23 = smul.u32 14, %s3090_s15  ;;  %s257_s24 = sadd.s32 1, %s3090_s15  ;;  %vm390_vm0 = vcmask 1046528   ;;  %v3175_v6 = vld [vmem:[%s3794_s2 + $0x18] sm:$0xff]  }
   0xf   : > { %v3156_v2 = vunpack.c.l.bf16 %v3146_v0  ;;  %v2544_v3 = vunpack.c.l.bf16 %v3151_v1  ;;  %v2545_v4 = vunpack.c.h.bf16 %v3151_v1  ;;  %v1326_v5 = vunpack.c.h.bf16 %v3146_v0  ;;  %s258_s25 = smul.u32 14, %s257_s24  ;;  %v3180_v7 = vld [vmem:[%s3794_s2 + $0x8] sm:$0xff]  }
  0x10   : > { %p252_p4 = scmp.lt.s32.totalorder %s3153_s23, 41  ;;  %vm420_vm1 = vcmask 64512   ;;  %vm1117_vm2 = vcmask 1044480   ;;  %v1536_v16 = vunpack.c.l.bf16 %v3175_v6  ;;  %v749_v17 = vunpack.c.l.bf16 %v3180_v7  ;;  %p273_p6 = scmp.lt.s32.totalorder %s3153_s23, 27 }
  0x11   : > { %2814 = vmatprep.subr.mxu0 %v3156_v2  ;;  %2722 = vmatprep.subr.mxu1 %v2545_v4  ;;  %p259_p5 = scmp.lt.s32.totalorder %s258_s25, 41  ;;  %vm1327_vm3 = vcmask 1043456   ;;  %vm1694_vm4 = vcmask 1042432   ;;  %vm1904_vm5 = vcmask 1041408   ;;  %vm750_vm6 = vcmask 1045504  }
  0x12   : > { %2815 = vmatpush3.msra.mxu0 %v3156_v2  ;;  %2723 = vmatpush3.msra.mxu1 %v2545_v4  ;;  %s253_s26 = scalar_select %p252_p4, %s3153_s23, 41 }
  0x13   : > { %2837 = vmatprep.subr.mxu0 %v1326_v5  ;;  %2745 = vmatprep.subr.mxu1 %v2544_v3  ;;  %s3822_s25 = smov (!%p259_p5, %s258_s25), 41  ;;  %s3824_s23 = smov (!%p273_p6, %s3153_s23), 27 }
  0x14   : > { %s2365_s27 = sshll.u32 %s253_s26, 2  ;;  %s2366_s9 = sshll.u32 %s3822_s25, 2 }
  0x15   : > { %s3170_s30 = scalar_lea.vmem %s3792_s0, %s2365_s27  ;;  %s3222_s12 = scalar_lea.vmem %s3793_s1, %s2366_s9 }
  0x16   : > { %v3067_v8 = vld [vmem:[%s3170_s30] sm:$0xff]   ;;  %v3068_v9 = vld [vmem:[%s3170_s30 + $0x8] sm:$0xff]   ;;  %v3069_v12 = vld [vmem:[%s3170_s30 + $0x10] sm:$0xff]   ;;  %s2367_s20 = sshll.u32 %s3824_s23, 2 }
  0x17   : > { %v3186_v10 = vunpack.c.l.bf16 %v3067_v8  ;;  %v3188_v11 = vunpack.c.h.bf16 %v3067_v8  ;;  %v3191_v13 = vunpack.c.l.bf16 %v3068_v9  ;;  %v3193_v14 = vunpack.c.h.bf16 %v3068_v9  ;;  %v3070_v15 = vld [vmem:[%s3170_s30 + $0x18] sm:$0xff]   ;;  %v3071_v22 = vld [vmem:[%s3170_s30 + $0x20] sm:$0xff]   ;;  %v3072_v39 = vld [vmem:[%s3170_s30 + $0x28] sm:$0xff]   ;;  %s3763_s24 = scalar_lea.vmem %s3796_s4, %s2367_s20 }
  0x18   : > { %v3202_v21 = vunpack.c.l.bf16 %v3069_v12  ;;  %v3212_v30 = vunpack.c.h.bf16 %v3069_v12  ;;  %v3233_v40 = vunpack.c.l.bf16 %v3070_v15  ;;  %v3235_v41 = vunpack.c.h.bf16 %v3070_v15  ;;  %v3073_v56 = vld [vmem:[%s3170_s30 + $0x30] sm:$0xff]  }
  0x19   : > { %v391_v18 = vrot.slane %v3186_v10, 1  ;;  %v392_v19 = vrot.slane %v3188_v11, 1  ;;  %v1118_v20 = vrot.slane %v3188_v11, 3  ;;  %v1119_v23 = vrot.slane %v3191_v13, 3 }
  0x1a   : > { %v394_v24 = vrot.slane %v3191_v13, 1  ;;  %v1121_v25 = vrot.slane %v3193_v14, 3  ;;  %v396_v26 = vrot.slane %v3193_v14, 1  ;;  %v1123_v28 = vrot.slane %v3202_v21, 3 }
  0x1b   : > { %v393_v27 = vsel %vm390_vm0, %v391_v18, %v392_v19  ;;  %v398_v29 = vrot.slane %v3202_v21, 1  ;;  %v1120_v31 = vsel %vm1117_vm2, %v1118_v20, %v1119_v23  ;;  %v1125_v37 = vrot.slane %v3212_v30, 3 }
  0x1c   : > { %2724 = vmatprep.mubr.msk.f32.mxu1 %vm420_vm1, %v393_v27  ;;  %v395_v32 = vsel %vm390_vm0, %v392_v19, %v394_v24  ;;  %v1122_v33 = vsel %vm1117_vm2, %v1119_v23, %v1121_v25  ;;  %v397_v34 = vsel %vm390_vm0, %v394_v24, %v396_v26  ;;  %2816 = vmatprep.mubr.msk.f32.mxu0 %vm420_vm1, %v1120_v31  ;;  %v400_v38 = vrot.slane %v3212_v30, 1 }
  0x1d   : > { %2725 = vmatmul.mubr.msk.f32.vlgmr.msra.gmra.mrb[0].mxu1 %vm420_vm1, %v395_v32  ;;  %v1124_v35 = vsel %vm1117_vm2, %v1121_v25, %v1123_v28  ;;  %v399_v36 = vsel %vm390_vm0, %v396_v26, %v398_v29  ;;  %2817 = vmatmul.mubr.msk.f32.vlgmr.msra.gmra.mrb[0].mxu0 %vm420_vm1, %v1122_v33  ;;  %v3237_v42 = vunpack.c.l.bf16 %v3071_v22  ;;  %v3239_v43 = vunpack.c.h.bf16 %v3071_v22 }
  0x1e   : > { %2727 = vmatprep.mubr.msk.f32.mxu1 %vm420_vm1, %v397_v34  ;;  %2838 = vmatpush3.msra.mxu0 %v1326_v5  ;;  %v1126_v44 = vsel %vm1117_vm2, %v1123_v28, %v1125_v37  ;;  %v401_v45 = vsel %vm390_vm0, %v398_v29, %v400_v38  ;;  %v1127_v46 = vrot.slane %v3233_v40, 3  ;;  %v402_v47 = vrot.slane %v3233_v40, 1  ;;  %v3285_v5 = vld [vmem:[%s3222_s12] sm:$0xff]  }
  0x1f   : > { %2819 = vmatprep.mubr.msk.f32.mxu0 %vm420_vm1, %v1124_v35  ;;  %2746 = vmatpush3.msra.mxu1 %v2544_v3  ;;  %v1129_v48 = vrot.slane %v3235_v41, 3  ;;  %v404_v49 = vrot.slane %v3235_v41, 1  ;;  %v1131_v50 = vrot.slane %v3237_v42, 3  ;;  %v406_v51 = vrot.slane %v3237_v42, 1 }
  0x20   : > { %2860 = vmatprep.subr.mxu0 %v1536_v16  ;;  %2768 = vmatprep.subr.mxu1 %v749_v17  ;;  %v1128_v52 = vsel %vm1117_vm2, %v1125_v37, %v1127_v46  ;;  %v403_v53 = vsel %vm390_vm0, %v400_v38, %v402_v47  ;;  %v1133_v54 = vrot.slane %v3239_v43, 3  ;;  %v3262_v55 = vunpack.c.l.bf16 %v3072_v39 }
  0x21   : > { %2728 = vmatmul.mubr.msk.f32.gmra.mrb[2].mxu1 %vm420_vm1, %v399_v36  ;;  %2820 = vmatmul.mubr.msk.f32.gmra.mrb[2].mxu0 %vm420_vm1, %v1126_v44  ;;  %v1130_v57 = vsel %vm1117_vm2, %v1127_v46, %v1129_v48  ;;  %v405_v58 = vsel %vm390_vm0, %v402_v47, %v404_v49  ;;  %v408_v59 = vrot.slane %v3239_v43, 1  ;;  %v1132_v60 = vsel %vm1117_vm2, %v1129_v48, %v1131_v50 }
  0x22   : > { %2730 = vmatprep.mubr.msk.f32.mxu1 %vm420_vm1, %v401_v45  ;;  %2822 = vmatprep.mubr.msk.f32.mxu0 %vm420_vm1, %v1128_v52  ;;  %v1328_v61 = vrot.slane %v3188_v11, 4  ;;  %v1329_v62 = vrot.slane %v3191_v13, 4  ;;  %v3273_v63 = vunpack.c.h.bf16 %v3072_v39  ;;  %v407_v0 = vsel %vm390_vm0, %v404_v49, %v406_v51 }
  0x23   : > { %v1134_v1 = vsel %vm1117_vm2, %v1131_v50, %v1133_v54  ;;  %v410_v3 = vrot.slane %v3262_v55, 1  ;;  %v3282_v4 = vunpack.c.l.bf16 %v3073_v56  ;;  %v409_v8 = vsel %vm390_vm0, %v406_v51, %v408_v59 }
  0x24   : > { %v1331_v9 = vrot.slane %v3193_v14, 4  ;;  %v412_v12 = vrot.slane %v3273_v63, 1  ;;  %v3291_v15 = vunpack.c.h.bf16 %v3073_v56  ;;  %v1330_v18 = vsel %vm1327_vm3, %v1328_v61, %v1329_v62 }
  0x25   : > { %2731 = vmatmul.mubr.msk.f32.gmra.mrb[4].mxu1 %vm420_vm1, %v403_v53  ;;  %2823 = vmatmul.mubr.msk.f32.gmra.mrb[4].mxu0 %vm420_vm1, %v1130_v57  ;;  %v1333_v19 = vrot.slane %v3202_v21, 4  ;;  %v411_v20 = vsel %vm390_vm0, %v408_v59, %v410_v3  ;;  %v414_v22 = vrot.slane %v3282_v4, 1  ;;  %v3301_v23 = vunpack.c.l.bf16 %v3285_v5 }
  0x26   : > { %2733 = vmatprep.mubr.msk.f32.mxu1 %vm420_vm1, %v405_v58  ;;  %2825 = vmatprep.mubr.msk.f32.mxu0 %vm420_vm1, %v1132_v60  ;;  %v3305_v24 = vsel %vm1327_vm3, %v1329_v62, %v1331_v9  ;;  %v413_v25 = vsel %vm390_vm0, %v410_v3, %v412_v12  ;;  %v1335_v26 = vrot.slane %v3212_v30, 4  ;;  %v416_v27 = vrot.slane %v3291_v15, 1 }
  0x27   : > { %v3311_v28 = vsel %vm1327_vm3, %v1331_v9, %v1333_v19  ;;  %v1337_v29 = vrot.slane %v3233_v40, 4  ;;  %v3800_v31 = vunpack.c.h.bf16 %v3175_v6  ;;  %v415_v32 = vsel %vm390_vm0, %v412_v12, %v414_v22 }
  0x28   : > { %v418_v33 = vrot.slane %v3301_v23, 1  ;;  %v3326_v34 = vsel %vm1327_vm3, %v1333_v19, %v1335_v26  ;;  %v417_v35 = vsel %vm390_vm0, %v414_v22, %v416_v27  ;;  %v1339_v36 = vrot.slane %v3235_v41, 4 }
  0x29   : > { %2734 = vmatmul.mubr.msk.f32.gmra.mrb[6].mxu1 %vm420_vm1, %v407_v0  ;;  %2826 = vmatmul.mubr.msk.f32.gmra.mrb[6].mxu0 %vm420_vm1, %v1134_v1  ;;  %v3331_v37 = vsel %vm1327_vm3, %v1335_v26, %v1337_v29  ;;  %v1341_v38 = vrot.slane %v3237_v42, 4  ;;  %v1343_v39 = vrot.slane %v3239_v43, 4  ;;  %v1345_v45 = vrot.slane %v3262_v55, 4 }
  0x2a   : > { %2736 = vmatprep.mubr.msk.f32.mxu1 %vm420_vm1, %v409_v8  ;;  %2839 = vmatprep.mubr.msk.f32.mxu0 %vm420_vm1, %v1330_v18  ;;  %v3345_v44 = vsel %vm1327_vm3, %v1337_v29, %v1339_v36  ;;  %v1695_v46 = vrot.slane %v3191_v13, 5  ;;  %v1696_v47 = vrot.slane %v3193_v14, 5  ;;  %v1698_v49 = vrot.slane %v3202_v21, 5 }
  0x2b   : > { %v3351_v48 = vsel %vm1327_vm3, %v1339_v36, %v1341_v38  ;;  %v3799_v50 = vunpack.c.h.bf16 %v3180_v7  ;;  %v1700_v52 = vrot.slane %v3212_v30, 5  ;;  %v3365_v53 = vsel %vm1327_vm3, %v1341_v38, %v1343_v39 }
  0x2c   : > { %v3357_v51 = vsel %vm1694_vm4, %v1695_v46, %v1696_v47  ;;  %v1347_v56 = vrot.slane %v3273_v63, 4  ;;  %v1349_v57 = vrot.slane %v3282_v4, 4  ;;  %v3370_v58 = vsel %vm1694_vm4, %v1696_v47, %v1698_v49 }
  0x2d   : > { %2737 = vmatmul.mubr.msk.f32.gmra.mrb[8].mxu1 %vm420_vm1, %v411_v20  ;;  %2840 = vmatmul.mubr.msk.f32.vlgmr.msra.gmra.mrb[0].mxu0 %vm420_vm1, %v3305_v24  ;;  %v3375_v59 = vsel %vm1327_vm3, %v1343_v39, %v1345_v45  ;;  %v3378_v60 = vsel %vm1694_vm4, %v1698_v49, %v1700_v52  ;;  %v1702_v61 = vrot.slane %v3233_v40, 5  ;;  %v1704_v62 = vrot.slane %v3235_v41, 5 }
  0x2e   : > { %2739 = vmatprep.mubr.msk.f32.mxu1 %vm420_vm1, %v413_v25  ;;  %2861 = vmatpush3.msra.mxu0 %v1536_v16  ;;  %v419_v16 = vsel %vm390_vm0, %v416_v27, %v418_v33  ;;  %v1351_v0 = vrot.slane %v3291_v15, 4  ;;  %v3384_v1 = vunpack.c.h.bf16 %v3285_v5  ;;  %v1706_v3 = vrot.slane %v3237_v42, 5 }
  0x2f   : > { %2842 = vmatprep.mubr.msk.f32.mxu0 %vm420_vm1, %v3311_v28  ;;  %2883 = vmatprep.subr.mxu0 %v3800_v31  ;;  %v1708_v8 = vrot.slane %v3239_v43, 5  ;;  %v1353_v9 = vrot.slane %v3301_v23, 4  ;;  %v3392_v12 = vsel %vm1694_vm4, %v1700_v52, %v1702_v61  ;;  %v3395_v18 = vsel %vm1694_vm4, %v1702_v61, %v1704_v62 }
  0x30   : > { %v1710_v19 = vrot.slane %v3262_v55, 5  ;;  %v3403_v5 = vsel %vm1327_vm3, %v1345_v45, %v1347_v56  ;;  %v3406_v20 = vsel %vm1694_vm4, %v1704_v62, %v1706_v3  ;;  %v1712_v25 = vrot.slane %v3273_v63, 5 }
  0x31   : > { %2740 = vmatmul.mubr.msk.f32.gmra.mrb[10].mxu1 %vm420_vm1, %v415_v32  ;;  %2843 = vmatmul.mubr.msk.f32.gmra.mrb[2].mxu0 %vm420_vm1, %v3326_v34  ;;  %v3409_v22 = vsel %vm1694_vm4, %v1706_v3, %v1708_v8  ;;  %v1714_v27 = vrot.slane %v3282_v4, 5  ;;  %v1716_v29 = vrot.slane %v3291_v15, 5  ;;  %v3797_v32 = vrot.slane %v3301_v23, 5 }
  0x32   : > { %2742 = vmatprep.mubr.msk.f32.mxu1 %vm420_vm1, %v417_v35  ;;  %2845 = vmatprep.mubr.msk.f32.mxu0 %vm420_vm1, %v3331_v37  ;;  %v3417_v26 = vsel %vm1694_vm4, %v1708_v8, %v1710_v19  ;;  %v3423_v33 = vsel %vm1327_vm3, %v1347_v56, %v1349_v57  ;;  %v3798_v35 = vrot.slane %v3384_v1, 4  ;;  %v3429_v36 = vsel %vm1694_vm4, %v1710_v19, %v1712_v25 }
  0x33   : > { %v3435_v38 = vsel %vm1694_vm4, %v1712_v25, %v1714_v27  ;;  %v3443_v39 = vsel %vm1694_vm4, %v1716_v29, %v3797_v32  ;;  %v1906_v45 = vrot.slane %v3193_v14, 6  ;;  %v3451_v46 = vsel %vm1327_vm3, %v1349_v57, %v1351_v0 }
  0x34   : > { %v1908_v47 = vrot.slane %v3202_v21, 6  ;;  %v1910_v49 = vrot.slane %v3212_v30, 6  ;;  %v3458_v52 = vsel %vm1327_vm3, %v1351_v0, %v1353_v9  ;;  %v1912_v61 = vrot.slane %v3233_v40, 6 }
  0x35   : > { %2743 = vmatmul.mubr.msk.f32.gmra.mrb[12].mxu1 %vm420_vm1, %v419_v16  ;;  %2846 = vmatmul.mubr.msk.f32.gmra.mrb[4].mxu0 %vm420_vm1, %v3345_v44  ;;  %v3438_v16 = vsel %vm1694_vm4, %v1714_v27, %v1716_v29  ;;  %v1914_v62 = vrot.slane %v3235_v41, 6  ;;  %v1916_v8 = vrot.slane %v3237_v42, 6  ;;  %v1135_v19 = vrot.slane %v3262_v55, 3 }
  0x36   : > { %2747 = vmatprep.mubr.msk.f32.mxu1 %vm420_vm1, %v3186_v10  ;;  %2848 = vmatprep.mubr.msk.f32.mxu0 %vm420_vm1, %v3351_v48  ;;  %v3466_v57 = vsel %vm1904_vm5, %v1906_v45, %v1908_v47  ;;  %v3469_v3 = vsel %vm1904_vm5, %v1908_v47, %v1910_v49  ;;  %v3478_v0 = vsel %vm1327_vm3, %v1353_v9, %v3798_v35  ;;  %v1918_v29 = vrot.slane %v3239_v43, 6 }
  0x37   : > { %v3481_v25 = vsel %vm1904_vm5, %v1910_v49, %v1912_v61  ;;  %v3484_v27 = vsel %vm1904_vm5, %v1912_v61, %v1914_v62  ;;  %v3497_v9 = vsel %vm1117_vm2, %v1133_v54, %v1135_v19  ;;  %v1920_v47 = vrot.slane %v3262_v55, 6 }
  0x38   : > { %v3504_v49 = vsel %vm1904_vm5, %v1916_v8, %v1918_v29  ;;  %v1139_v61 = vrot.slane %v3282_v4, 3  ;;  %v1141_v32 = vrot.slane %v3291_v15, 3  ;;  %v1143_v31 = vrot.slane %v3301_v23, 3 }
  0x39   : > { %2748 = vmatmul.mubr.msk.f32.vlgmr.msra.gmra.mrb[0].mxu1 %vm420_vm1, %v3188_v11  ;;  %2849 = vmatmul.mubr.msk.f32.gmra.mrb[6].mxu0 %vm420_vm1, %v3365_v53  ;;  %3801 = vst [vmem:[#allocation2_spill] sm:$0xff] %v3504_v49  ;;  %v3513_v54 = vsel %vm1904_vm5, %v1918_v29, %v1920_v47 }
  0x3a   : > { %2750 = vmatprep.mubr.msk.f32.mxu1 %vm420_vm1, %v3191_v13  ;;  %2851 = vmatprep.mubr.msk.f32.mxu0 %vm420_vm1, %v3375_v59  ;;  %3803 = vst [vmem:[#allocation4_spill] sm:$0xff] %v3513_v54  ;;  %v3531_v29 = vsel %vm1117_vm2, %v1139_v61, %v1141_v32  ;;  %v1926_v54 = vrot.slane %v3291_v15, 6 }
  0x3b   : > { %2769 = vmatpush3.msra.mxu1 %v749_v17  ;;  %v1905_v17 = vrot.slane %v3191_v13, 6  ;;  %3806 = vst [vmem:[#allocation7_spill] sm:$0xff] %v3531_v29  ;;  %v1930_v29 = vrot.slane %v3384_v1, 6 }
  0x3c   : > { %2791 = vmatprep.subr.mxu1 %v3799_v50  ;;  %v1924_v50 = vrot.slane %v3282_v4, 6 }
  0x3d   : > { %2751 = vmatmul.mubr.msk.f32.gmra.mrb[2].mxu1 %vm420_vm1, %v3193_v14  ;;  %2852 = vmatmul.mubr.msk.f32.gmra.mrb[8].mxu0 %vm420_vm1, %v3403_v5  ;;  %v3461_v56 = vsel %vm1904_vm5, %v1905_v17, %v1906_v45  ;;  %v3492_v17 = vsel %vm1904_vm5, %v1914_v62, %v1916_v8  ;;  %v1137_v45 = vrot.slane %v3273_v63, 3  ;;  %v1922_v62 = vrot.slane %v3273_v63, 6  ;;  %v3522_v8 = vld [vmem:[%s3794_s2 + $0x20] sm:$0xf] }
  0x3e   : > { %2753 = vmatprep.mubr.msk.f32.mxu1 %vm420_vm1, %v3202_v21  ;;  %2854 = vmatprep.mubr.msk.f32.mxu0 %vm420_vm1, %v3423_v33 }
  0x3f   : > { %v3510_v35 = vsel %vm1117_vm2, %v1135_v19, %v1137_v45  ;;  %v3525_v49 = vsel %vm1117_vm2, %v1137_v45, %v1139_v61  ;;  %v3528_v19 = vsel %vm1904_vm5, %v1920_v47, %v1922_v62  ;;  %v3542_v45 = vsel %vm1117_vm2, %v1141_v32, %v1143_v31 }
  0x40   : > { %3802 = vst [vmem:[#allocation3_spill] sm:$0xff] %v3510_v35  ;;  %3804 = vst [vmem:[#allocation5_spill] sm:$0xff] %v3525_v49  ;;  %v3539_v35 = vsel %vm1904_vm5, %v1922_v62, %v1924_v50  ;;  %v1145_v47 = vrot.slane %v3384_v1, 3  ;;  %v3549_v61 = vsel %vm1904_vm5, %v1924_v50, %v1926_v54  ;;  %v1903_v49 = vunpack.c.l.bf16 %v3522_v8 }
  0x41   : > { %2754 = vmatmul.mubr.msk.f32.gmra.mrb[4].mxu1 %vm420_vm1, %v3212_v30  ;;  %2855 = vmatmul.mubr.msk.f32.gmra.mrb[10].mxu0 %vm420_vm1, %v3451_v46  ;;  %3805 = vst [vmem:[#allocation6_spill] sm:$0xff] %v3528_v19  ;;  %v1928_v19 = vrot.slane %v3301_v23, 6  ;;  %v751_v50 = vrot.slane %v3186_v10, 2 }
  0x42   : > { %2756 = vmatprep.mubr.msk.f32.mxu1 %vm420_vm1, %v3233_v40  ;;  %2857 = vmatprep.mubr.msk.f32.mxu0 %vm420_vm1, %v3458_v52  ;;  %v3554_v62 = vsel %vm1117_vm2, %v1143_v31, %v1145_v47  ;;  %v3807_v31 = vunpack.c.h.bf16 %v3175_v6  ;;  %v754_v6 = vrot.slane %v3191_v13, 2 }
  0x43   : > { %v3557_v32 = vsel %vm1904_vm5, %v1926_v54, %v1928_v19  ;;  %v752_v54 = vrot.slane %v3188_v11, 2  ;;  %v756_v11 = vrot.slane %v3193_v14, 2  ;;  %v3075_v14 = vld [vmem:[%s3222_s12 + $0x8] sm:$0xf]  }
  0x45   : > { %2757 = vmatmul.mubr.msk.f32.gmra.mrb[6].mxu1 %vm420_vm1, %v3235_v41  ;;  %2858 = vmatmul.mubr.msk.f32.gmra.mrb[12].mxu0 %vm420_vm1, %v3478_v0  ;;  %v753_v10 = vsel %vm750_vm6, %v751_v50, %v752_v54  ;;  %v757_v13 = vsel %vm750_vm6, %v754_v6, %v756_v11  ;;  %v776_v50 = vrot.slane %v3291_v15, 2 }
  0x46   : > { %2759 = vmatprep.mubr.msk.f32.mxu1 %vm420_vm1, %v3237_v42  ;;  %2862 = vmatprep.mubr.msk.f32.mxu0 %vm420_vm1, %v3305_v24  ;;  %v3564_v24 = vsel %vm1904_vm5, %v1928_v19, %v1930_v29  ;;  %v3613_v19 = vunpack.c.l.bf16 %v3075_v14 }
  0x49   : > { %2760 = vmatmul.mubr.msk.f32.gmra.mrb[8].mxu1 %vm420_vm1, %v3239_v43  ;;  %2863 = vmatmul.mubr.msk.f32.vlgmr.msra.gmra.mrb[0].mxu0 %vm420_vm1, %v3311_v28  ;;  %v755_v28 = vsel %vm750_vm6, %v752_v54, %v754_v6  ;;  %v778_v54 = vrot.slane %v3301_v23, 2 }
  0x4a   : > { %2762 = vmatprep.mubr.msk.f32.mxu1 %vm420_vm1, %v3262_v55  ;;  %2884 = vmatpush3.msra.mxu0 %v3807_v31  ;;  %v772_v31 = vrot.slane %v3273_v63, 2 }
  0x4b   : > { %2865 = vmatprep.mubr.msk.f32.mxu0 %vm420_vm1, %v3326_v34  ;;  %2906 = vmatprep.subr.mxu0 %v1903_v49  ;;  %v758_v34 = vrot.slane %v3202_v21, 2  ;;  %v3808_v21 = vunpack.c.h.bf16 %v3180_v7  ;;  %v766_v7 = vrot.slane %v3237_v42, 2  ;;  %v770_v42 = vrot.slane %v3262_v55, 2 }
  0x4c   : > { %v774_v55 = vrot.slane %v3282_v4, 2 }
  0x4d   : > { %2763 = vmatmul.mubr.msk.f32.gmra.mrb[10].mxu1 %vm420_vm1, %v3273_v63  ;;  %2866 = vmatmul.mubr.msk.f32.gmra.mrb[2].mxu0 %vm420_vm1, %v3331_v37  ;;  %v760_v37 = vrot.slane %v3212_v30, 2 }
  0x4e   : > { %2765 = vmatprep.mubr.msk.f32.mxu1 %vm420_vm1, %v3282_v4  ;;  %2868 = vmatprep.mubr.msk.f32.mxu0 %vm420_vm1, %v3345_v44  ;;  %v759_v44 = vsel %vm750_vm6, %v756_v11, %v758_v34  ;;  %v775_v63 = vsel %vm750_vm6, %v772_v31, %v774_v55  ;;  %v777_v4 = vsel %vm750_vm6, %v774_v55, %v776_v50 }
  0x4f   : > { %v761_v30 = vsel %vm750_vm6, %v758_v34, %v760_v37 }
  0x51   : > { %2766 = vmatmul.mubr.msk.f32.gmra.mrb[12].mxu1 %vm420_vm1, %v3291_v15  ;;  %2869 = vmatmul.mubr.msk.f32.gmra.mrb[4].mxu0 %vm420_vm1, %v3351_v48  ;;  %v762_v48 = vrot.slane %v3233_v40, 2  ;;  %v779_v15 = vsel %vm750_vm6, %v776_v50, %v778_v54 }
  0x52   : > { %2770 = vmatprep.mubr.msk.f32.mxu1 %vm420_vm1, %v753_v10  ;;  %2871 = vmatprep.mubr.msk.f32.mxu0 %vm420_vm1, %v3365_v53  ;;  %v764_v53 = vrot.slane %v3235_v41, 2 }
  0x53   : > { %v763_v40 = vsel %vm750_vm6, %v760_v37, %v762_v48 }
  0x54   : > { %v765_v41 = vsel %vm750_vm6, %v762_v48, %v764_v53 }
  0x55   : > { %2771 = vmatmul.mubr.msk.f32.vlgmr.msra.gmra.mrb[0].mxu1 %vm420_vm1, %v755_v28  ;;  %2872 = vmatmul.mubr.msk.f32.gmra.mrb[6].mxu0 %vm420_vm1, %v3375_v59  ;;  %v1538_v59 = vrot.slane %v3613_v19, 4 }
  0x56   : > { %2773 = vmatprep.mubr.msk.f32.mxu1 %vm420_vm1, %v757_v13  ;;  %2874 = vmatprep.mubr.msk.f32.mxu0 %vm420_vm1, %v3403_v5  ;;  %v768_v5 = vrot.slane %v3239_v43, 2 }
  0x57   : > { %2792 = vmatpush3.msra.mxu1 %v3808_v21 }
  0x58   : > { %2929 = vmatprep.subr.mxu1 %v3156_v2  ;;  %v769_v43 = vsel %vm750_vm6, %v766_v7, %v768_v5 }
  0x59   : > { %2774 = vmatmul.mubr.msk.f32.gmra.mrb[2].mxu1 %vm420_vm1, %v759_v44  ;;  %2875 = vmatmul.mubr.msk.f32.gmra.mrb[8].mxu0 %vm420_vm1, %v3423_v33  ;;  %v767_v33 = vsel %vm750_vm6, %v764_v53, %v766_v7 }
  0x5a   : > { %2776 = vmatprep.mubr.msk.f32.mxu1 %vm420_vm1, %v761_v30  ;;  %2877 = vmatprep.mubr.msk.f32.mxu0 %vm420_vm1, %v3451_v46  ;;  %v3809_v46 = vrot.slane %v3384_v1, 4 }
  0x5c   : > { %v1539_v47 = vsel %vm1327_vm3, %v3809_v46, %v1538_v59 }
  0x5d   : > { %2777 = vmatmul.mubr.msk.f32.gmra.mrb[4].mxu1 %vm420_vm1, %v763_v40  ;;  %2878 = vmatmul.mubr.msk.f32.gmra.mrb[10].mxu0 %vm420_vm1, %v3458_v52  ;;  %v771_v52 = vsel %vm750_vm6, %v768_v5, %v770_v42 }
  0x5e   : > { %2779 = vmatprep.mubr.msk.f32.mxu1 %vm420_vm1, %v765_v41  ;;  %2880 = vmatprep.mubr.msk.f32.mxu0 %vm420_vm1, %v3478_v0  ;;  %v773_v0 = vsel %vm750_vm6, %v770_v42, %v772_v31 }
  0x61   : > { %2780 = vmatmul.mubr.msk.f32.gmra.mrb[6].mxu1 %vm420_vm1, %v767_v33  ;;  %2881 = vmatmul.mubr.msk.f32.gmra.mrb[12].mxu0 %vm420_vm1, %v1539_v47 }
  0x62   : > { %2782 = vmatprep.mubr.msk.f32.mxu1 %vm420_vm1, %v769_v43  ;;  %2885 = vmatprep.mubr.msk.f32.mxu0 %vm420_vm1, %v3357_v51  ;;  %v1720_v51 = vrot.slane %v3384_v1, 5 }
  0x65   : > { %2783 = vmatmul.mubr.msk.f32.gmra.mrb[8].mxu1 %vm420_vm1, %v771_v52  ;;  %2886 = vmatmul.mubr.msk.f32.vlgmr.msra.gmra.mrb[0].mxu0 %vm420_vm1, %v3370_v58  ;;  %v1722_v58 = vrot.slane %v3613_v19, 5 }
  0x66   : > { %2785 = vmatprep.mubr.msk.f32.mxu1 %vm420_vm1, %v773_v0  ;;  %2907 = vmatpush3.msra.mxu0 %v1903_v49 }
  0x67   : > { %2888 = vmatprep.mubr.msk.f32.mxu0 %vm420_vm1, %v3378_v60  ;;  %v3810_v60 = vrot.slane %v3301_v23, 5  ;;  %v961_v23 = vrot.slane %v3384_v1, 2 }
  0x69   : > { %2786 = vmatmul.mubr.msk.f32.gmra.mrb[10].mxu1 %vm420_vm1, %v775_v63  ;;  %2889 = vmatmul.mubr.msk.f32.gmra.mrb[2].mxu0 %vm420_vm1, %v3392_v12  ;;  %v1721_v12 = vsel %vm1694_vm4, %v3810_v60, %v1720_v51 }
  0x6a   : > { %2788 = vmatprep.mubr.msk.f32.mxu1 %vm420_vm1, %v777_v4  ;;  %2891 = vmatprep.mubr.msk.f32.mxu0 %vm420_vm1, %v3395_v18  ;;  %v962_v18 = vsel %vm750_vm6, %v778_v54, %v961_v23 }
  0x6d   : > { %2789 = vmatmul.mubr.msk.f32.gmra.mrb[12].mxu1 %vm420_vm1, %v779_v15  ;;  %2892 = vmatmul.mubr.msk.f32.gmra.mrb[4].mxu0 %vm420_vm1, %v3406_v20  ;;  %v3811_v20 = vld [vmem:[#allocation2_spill] sm:$0xff] }
  0x6e   : > { %2793 = vmatprep.mubr.msk.f32.mxu1 %vm420_vm1, %v755_v28  ;;  %2894 = vmatprep.mubr.msk.f32.mxu0 %vm420_vm1, %v3409_v22  ;;  %v3812_v22 = vld [vmem:[#allocation3_spill] sm:$0xff] }
  0x71   : > { %2794 = vmatmul.mubr.msk.f32.vlgmr.msra.gmra.mrb[0].mxu1 %vm420_vm1, %v757_v13  ;;  %2895 = vmatmul.mubr.msk.f32.gmra.mrb[6].mxu0 %vm420_vm1, %v3417_v26  ;;  %v3813_v26 = vld [vmem:[#allocation4_spill] sm:$0xff] }
  0x72   : > { %2796 = vmatprep.mubr.msk.f32.mxu1 %vm420_vm1, %v759_v44  ;;  %2897 = vmatprep.mubr.msk.f32.mxu0 %vm420_vm1, %v3429_v36  ;;  %v3814_v36 = vld [vmem:[#allocation5_spill] sm:$0xff] }
  0x73   : > { %2930 = vmatpush3.msra.mxu1 %v3156_v2  ;;  %v1723_v2 = vsel %vm1694_vm4, %v1720_v51, %v1722_v58 }
  0x75   : > { %2797 = vmatmul.mubr.msk.f32.gmra.mrb[2].mxu1 %vm420_vm1, %v761_v30  ;;  %2898 = vmatmul.mubr.msk.f32.gmra.mrb[8].mxu0 %vm420_vm1, %v3435_v38  ;;  %v3815_v38 = vld [vmem:[#allocation6_spill] sm:$0xff] }
  0x76   : > { %2799 = vmatprep.mubr.msk.f32.mxu1 %vm420_vm1, %v763_v40  ;;  %2900 = vmatprep.mubr.msk.f32.mxu0 %vm420_vm1, %v3438_v16  ;;  %v3816_v16 = vld [vmem:[#allocation7_spill] sm:$0xff] }
  0x79   : > { %2800 = vmatmul.mubr.msk.f32.gmra.mrb[4].mxu1 %vm420_vm1, %v765_v41  ;;  %2901 = vmatmul.mubr.msk.f32.gmra.mrb[10].mxu0 %vm420_vm1, %v3443_v39  ;;  %v1932_v39 = vrot.slane %v3613_v19, 6 }
  0x7a   : > { %2802 = vmatprep.mubr.msk.f32.mxu1 %vm420_vm1, %v767_v33  ;;  %2903 = vmatprep.mubr.msk.f32.mxu0 %vm420_vm1, %v1721_v12 }
  0x7d   : > { %2803 = vmatmul.mubr.msk.f32.gmra.mrb[6].mxu1 %vm420_vm1, %v769_v43  ;;  %2904 = vmatmul.mubr.msk.f32.gmra.mrb[12].mxu0 %vm420_vm1, %v1723_v2 }
  0x7e   : > { %2805 = vmatprep.mubr.msk.f32.mxu1 %vm420_vm1, %v771_v52  ;;  %2908 = vmatprep.mubr.msk.f32.mxu0 %vm420_vm1, %v3461_v56 }
  0x81   : > { %2806 = vmatmul.mubr.msk.f32.gmra.mrb[8].mxu1 %vm420_vm1, %v773_v0  ;;  %2909 = vmatmul.mubr.msk.f32.vlgmr.msra.gmra.mrb[0].mxu0 %vm420_vm1, %v3466_v57 }
  0x82   : > { %2808 = vmatprep.mubr.msk.f32.mxu1 %vm420_vm1, %v775_v63  ;;  %2911 = vmatprep.mubr.msk.f32.mxu0 %vm420_vm1, %v3469_v3 }
  0x85   : > { %2809 = vmatmul.mubr.msk.f32.gmra.mrb[10].mxu1 %vm420_vm1, %v777_v4  ;;  %2912 = vmatmul.mubr.msk.f32.gmra.mrb[2].mxu0 %vm420_vm1, %v3481_v25 }
  0x86   : > { %2811 = vmatprep.mubr.msk.f32.mxu1 %vm420_vm1, %v779_v15  ;;  %2914 = vmatprep.mubr.msk.f32.mxu0 %vm420_vm1, %v3484_v27 }
  0x89   : > { %2812 = vmatmul.mubr.msk.f32.gmra.mrb[12].mxu1 %vm420_vm1, %v962_v18  ;;  %2915 = vmatmul.mubr.msk.f32.gmra.mrb[4].mxu0 %vm420_vm1, %v3492_v17 }
  0x8a   : > { %2828 = vmatprep.mubr.msk.f32.mxu1 %vm420_vm1, %v3497_v9  ;;  %2917 = vmatprep.mubr.msk.f32.mxu0 %vm420_vm1, %v3811_v20 }
  0x8d   : > { %2829 = vmatmul.mubr.msk.f32.vlgmr.msra.gmra.mrb[8].mxu1 %vm420_vm1, %v3812_v22  ;;  %2918 = vmatmul.mubr.msk.f32.gmra.mrb[6].mxu0 %vm420_vm1, %v3813_v26 }
  0x8e   : > { %2831 = vmatprep.mubr.msk.f32.mxu1 %vm420_vm1, %v3814_v36  ;;  %2920 = vmatprep.mubr.msk.f32.mxu0 %vm420_vm1, %v3815_v38 }
  0x91   : > { %2832 = vmatmul.mubr.msk.f32.gmra.mrb[10].mxu1 %vm420_vm1, %v3816_v16  ;;  %2921 = vmatmul.mubr.msk.f32.gmra.mrb[8].mxu0 %vm420_vm1, %v3539_v35  ;;  %v1933_v35 = vsel %vm1904_vm5, %v1930_v29, %v1932_v39 }
  0x92   : > { %2834 = vmatprep.mubr.msk.f32.mxu1 %vm420_vm1, %v3542_v45  ;;  %2923 = vmatprep.mubr.msk.f32.mxu0 %vm420_vm1, %v3549_v61  ;;  %v3754_v45 = vld [vmem:[%s3795_s3] ss:$0 sm:$0xff] }
  0x95   : > { %2835 = vmatmul.mubr.msk.f32.gmra.mrb[12].mxu1 %vm420_vm1, %v3554_v62  ;;  %2924 = vmatmul.mubr.msk.f32.gmra.mrb[10].mxu0 %vm420_vm1, %v3557_v32 }
  0x96   : > { %2926 = vmatprep.mubr.msk.f32.mxu0 %vm420_vm1, %v3564_v24 }
  0x99   : > { %2927 = vmatmul.mubr.msk.f32.gmra.mrb[12].mxu0 %vm420_vm1, %v1933_v35 }
 0x144   : > { %v2795_v56 = vpop.f32.mrb[0].mxu1 }
 0x145   : > { %v1031_v57 = vpop.f32.mrb[1].mxu1 }
 0x148   : > { %v2798_v3 = vpop.f32.mrb[2].mxu1 }
 0x149   : > { %v1041_v25 = vpop.f32.mrb[3].mxu1 }
 0x14c   : > { %v2801_v27 = vpop.f32.mrb[4].mxu1 }
 0x14d   : > { %v1051_v17 = vpop.f32.mrb[5].mxu1 }
 0x150   : > { %v2804_v9 = vpop.f32.mrb[6].mxu1 }
 0x151   : > { %v1061_v49 = vpop.f32.mrb[7].mxu1 }
 0x154   : > { %v2910_v8 = vpop.f32.mrb[0].mxu0 }
 0x155   : > { %v2931_v1 = vadd.f32 %v2910_v8, %v2795_v56  ;;  %v2028_v29 = vpop.f32.mrb[1].mxu0 }
 0x156   : > { %v2932_v61 = vadd.f32 %v2028_v29, %v1031_v57 }
 0x157   : > { %v2119_v62 = vadd.f32 %v2931_v1, %v3754_v45 }
 0x158   : > { %v2118_v32 = vadd.f32 %v2932_v61, %v3754_v45  ;;  %v2913_v24 = vpop.f32.mrb[2].mxu0 }
 0x159   : > { %vm2133_vm7 = vcmp.gt.f32.partialorder %v2119_v62, 0.0  ;;  %v2147_v6 = vmul.f32 0.01, %v2119_v62  ;;  %v2933_v10 = vadd.f32 %v2913_v24, %v2798_v3  ;;  %v2038_v11 = vpop.f32.mrb[3].mxu0 }
 0x15a   : > { %vm2132_vm8 = vcmp.gt.f32.partialorder %v2118_v32, 0.0  ;;  %v2146_v28 = vmul.f32 0.01, %v2118_v32  ;;  %v2934_v34 = vadd.f32 %v2038_v11, %v1041_v25 }
 0x15b   : > { %v2161_v13 = vsel %vm2133_vm7, %v2119_v62, %v2147_v6  ;;  %v2121_v37 = vadd.f32 %v2933_v10, %v3754_v45 }
 0x15c   : > { %v2160_v14 = vsel %vm2132_vm8, %v2118_v32, %v2146_v28  ;;  %v2120_v44 = vadd.f32 %v2934_v34, %v3754_v45  ;;  %v2916_v48 = vpop.f32.mrb[4].mxu0 }
 0x15d   : > { %v2549_v21 = vpack.c.bf16 %v2161_v13, %v2160_v14  ;;  %vm2135_vm9 = vcmp.gt.f32.partialorder %v2121_v37, 0.0  ;;  %v2149_v30 = vmul.f32 0.01, %v2121_v37  ;;  %v2935_v53 = vadd.f32 %v2916_v48, %v2801_v27  ;;  %v2048_v19 = vpop.f32.mrb[5].mxu0 }
 0x15e   : > { %vm2134_vm10 = vcmp.gt.f32.partialorder %v2120_v44, 0.0  ;;  %v2148_v40 = vmul.f32 0.01, %v2120_v44  ;;  %v2936_v7 = vadd.f32 %v2048_v19, %v1051_v17 }
 0x15f   : > { %2550 = vst [vmem:[%s3763_s24] sm:$0xff] %v2549_v21   ;;  %v2163_v41 = vsel %vm2135_vm9, %v2121_v37, %v2149_v30  ;;  %v2123_v59 = vadd.f32 %v2935_v53, %v3754_v45 }
 0x160   : > { %v2830_v5 = vpop.f32.mrb[8].mxu1  ;;  %v2162_v33 = vsel %vm2134_vm10, %v2120_v44, %v2148_v40  ;;  %v2122_v42 = vadd.f32 %v2936_v7, %v3754_v45  ;;  %v2919_v46 = vpop.f32.mrb[6].mxu0 }
 0x161   : > { %v1281_v47 = vpop.f32.mrb[9].mxu1  ;;  %v2554_v43 = vpack.c.bf16 %v2163_v41, %v2162_v33  ;;  %vm2137_vm11 = vcmp.gt.f32.partialorder %v2123_v59, 0.0  ;;  %v2151_v31 = vmul.f32 0.01, %v2123_v59  ;;  %v2937_v52 = vadd.f32 %v2919_v46, %v2804_v9  ;;  %v2058_v55 = vpop.f32.mrb[7].mxu0 }
 0x162   : > { %vm2136_vm12 = vcmp.gt.f32.partialorder %v2122_v42, 0.0  ;;  %v2150_v0 = vmul.f32 0.01, %v2122_v42  ;;  %v2938_v50 = vadd.f32 %v2058_v55, %v1061_v49 }
 0x163   : > { %2581 = vst [vmem:[%s3763_s24 + $0x8] sm:$0xff] %v2554_v43   ;;  %v2165_v63 = vsel %vm2137_vm11, %v2123_v59, %v2151_v31  ;;  %v2125_v54 = vadd.f32 %v2937_v52, %v3754_v45 }
 0x164   : > { %v2833_v4 = vpop.f32.mrb[10].mxu1  ;;  %v2164_v15 = vsel %vm2136_vm12, %v2122_v42, %v2150_v0  ;;  %v2124_v51 = vadd.f32 %v2938_v50, %v3754_v45  ;;  %v2922_v58 = vpop.f32.mrb[8].mxu0 }
 0x165   : > { %v1291_v60 = vpop.f32.mrb[11].mxu1  ;;  %v2559_v12 = vpack.c.bf16 %v2165_v63, %v2164_v15  ;;  %vm2139_vm13 = vcmp.gt.f32.partialorder %v2125_v54, 0.0  ;;  %v2153_v2 = vmul.f32 0.01, %v2125_v54  ;;  %v2939_v23 = vadd.f32 %v2922_v58, %v2830_v5  ;;  %v2068_v18 = vpop.f32.mrb[9].mxu0 }
 0x166   : > { %vm2138_vm14 = vcmp.gt.f32.partialorder %v2124_v51, 0.0  ;;  %v2152_v20 = vmul.f32 0.01, %v2124_v51  ;;  %v2940_v22 = vadd.f32 %v2068_v18, %v1281_v47 }
 0x167   : > { %2582 = vst [vmem:[%s3763_s24 + $0x10] sm:$0xff] %v2559_v12   ;;  %v2167_v26 = vsel %vm2139_vm13, %v2125_v54, %v2153_v2  ;;  %v2127_v36 = vadd.f32 %v2939_v23, %v3754_v45 }
 0x168   : > { %v2836_v38 = vpop.f32.mrb[12].mxu1  ;;  %v2166_v16 = vsel %vm2138_vm14, %v2124_v51, %v2152_v20  ;;  %v2126_v39 = vadd.f32 %v2940_v22, %v3754_v45  ;;  %v2925_v35 = vpop.f32.mrb[10].mxu0 }
 0x169   : > { %v1301_v56 = vpop.f32.mrb[13].mxu1  ;;  %v2564_v57 = vpack.c.bf16 %v2167_v26, %v2166_v16  ;;  %vm2141_vm15 = vcmp.gt.f32.partialorder %v2127_v36, 0.0  ;;  %v2155_v3 = vmul.f32 0.01, %v2127_v36  ;;  %v2941_v25 = vadd.f32 %v2925_v35, %v2833_v4  ;;  %v2078_v27 = vpop.f32.mrb[11].mxu0 }
 0x16a   : > { %vm2140_vm0 = vcmp.gt.f32.partialorder %v2126_v39, 0.0  ;;  %v2154_v17 = vmul.f32 0.01, %v2126_v39  ;;  %v2942_v9 = vadd.f32 %v2078_v27, %v1291_v60 }
 0x16b   : > { %2583 = vst [vmem:[%s3763_s24 + $0x18] sm:$0xff] %v2564_v57   ;;  %v2169_v49 = vsel %vm2141_vm15, %v2127_v36, %v2155_v3  ;;  %v2129_v8 = vadd.f32 %v2941_v25, %v3754_v45 }
 0x16c   : > { %v2168_v1 = vsel %vm2140_vm0, %v2126_v39, %v2154_v17  ;;  %v2128_v29 = vadd.f32 %v2942_v9, %v3754_v45  ;;  %v2928_v61 = vpop.f32.mrb[12].mxu0 }
 0x16d   : > { %v2569_v62 = vpack.c.bf16 %v2169_v49, %v2168_v1  ;;  %vm2143_vm1 = vcmp.gt.f32.partialorder %v2129_v8, 0.0  ;;  %v2157_v32 = vmul.f32 0.01, %v2129_v8  ;;  %v2943_v24 = vadd.f32 %v2928_v61, %v2836_v38  ;;  %v2088_v6 = vpop.f32.mrb[13].mxu0 }
 0x16e   : > { %vm2142_vm2 = vcmp.gt.f32.partialorder %v2128_v29, 0.0  ;;  %v2156_v10 = vmul.f32 0.01, %v2128_v29  ;;  %v2944_v11 = vadd.f32 %v2088_v6, %v1301_v56 }
 0x16f   : > { %2584 = vst [vmem:[%s3763_s24 + $0x20] sm:$0xff] %v2569_v62   ;;  %v2171_v28 = vsel %vm2143_vm1, %v2129_v8, %v2157_v32  ;;  %v2131_v34 = vadd.f32 %v2943_v24, %v3754_v45 }
 0x170   : > { %v2170_v13 = vsel %vm2142_vm2, %v2128_v29, %v2156_v10  ;;  %v2130_v37 = vadd.f32 %v2944_v11, %v3754_v45 }
 0x171   : > { %v2574_v14 = vpack.c.bf16 %v2171_v28, %v2170_v13  ;;  %vm2145_vm3 = vcmp.gt.f32.partialorder %v2131_v34, 0.0  ;;  %v2159_v44 = vmul.f32 0.01, %v2131_v34 }
 0x172   : > { %vm2144_vm4 = vcmp.gt.f32.partialorder %v2130_v37, 0.0  ;;  %v2158_v48 = vmul.f32 0.01, %v2130_v37 }
 0x173   : > { %2585 = vst [vmem:[%s3763_s24 + $0x28] sm:$0xff] %v2574_v14   ;;  %v2173_v21 = vsel %vm2145_vm3, %v2131_v34, %v2159_v44 }
 0x174   : > { %v2172_v30 = vsel %vm2144_vm4, %v2130_v37, %v2158_v48 }
 0x175   : > { %v2579_v53 = vpack.c.bf16 %v2173_v21, %v2172_v30 }
 0x177   : > { %2586 = vst [vmem:[%s3763_s24 + $0x30] sm:$0xff] %v2579_v53  }
 0x178 PF: > { %s14_s17 = sadd.s32 1, %s3098_s17   ;;  %s3817_s15 = smov %s3094_s16 }
 0x179   : > { %p11_p7 = scmp.ge.s32.totalorder %s14_s17, 4   ;;  %s3818_s16 = smov %s3820_s18 }
 0x17b   :  { %13 = sbr.rel (!%p11_p7) target bundleno = 2 (0x2), region = 83 }

// kernel: double_conv11.5
= control target key start
LH: loop header
LB: loop body
LE: loop exit
PB: predicated region body
PF: predicated region fallthrough
CT: control target
= control target key end

     0   :  { %s3000_s15 = smov 0   ;;  %s3002_s16 = smov 0   ;;  %s3674_s0 = inlined_call_operand.vmem [shape: bf16[336,8], index: 0, kind: input, shape index: {}, may-alias: {0,1}]   ;;  %s3675_s1 = inlined_call_operand.vmem [shape: bf16[336,8], index: 1, kind: input, shape index: {}, may-alias: {0,1}]   ;;  %s3676_s2 = inlined_call_operand.vmem [shape: bf16[9,8,128], index: 2, kind: input, shape index: {}]   ;;  %s3677_s3 = inlined_call_operand.vmem [shape: f32[1,128], index: 3, kind: input, shape index: {}]   ;;  %s3678_s4 = inlined_call_operand.vmem [shape: f32[224,128], index: 4, kind: output, shape index: {}]  }
   0x1   :  { %s3004_s17 = smov 0  }
   0x2 LB: > { %s26_s18 = sadd.s32 1, %s2969_s16  ;;  %p2308_p0 = scmp.ge.s32.totalorder %s2973_s17, 1  ;;  %s2973_s17 = sphi %s3004_s17, %s14_s17   ;;  %s2969_s16 = sphi %s3002_s16, %s3700_s16   ;;  %s2965_s15 = sphi %s3000_s15, %s3699_s15  }
   0x3   : > { %p28_p1 = scmp.ge.s32.totalorder %s26_s18, 2  ;;  %p209_p2 = scmp.lt.s32.totalorder %s2973_s17, 3 }
   0x5   : > { %s3702_s18 = smov (%p28_p1, %s26_s18), 0  ;;  %p210_p3 = pnand %p2308_p0, %p209_p2 }
   0x7   : > { %213 = sbr.rel (%p210_p3) target bundleno = 374 (0x176), region = 36 }
   0xe   : > { %v3021_v0 = vld [vmem:[%s3676_s2 + $0x10] sm:$0xff]   ;;  %v3026_v1 = vld [vmem:[%s3676_s2] sm:$0xff]   ;;  %s3028_s23 = smul.u32 14, %s2965_s15  ;;  %s257_s24 = sadd.s32 1, %s2965_s15  ;;  %vm390_vm0 = vcmask 1046528   ;;  %v3050_v6 = vld [vmem:[%s3676_s2 + $0x18] sm:$0xff]  }
   0xf   : > { %v3031_v2 = vunpack.c.l.bf16 %v3021_v0  ;;  %v2460_v3 = vunpack.c.l.bf16 %v3026_v1  ;;  %v2461_v4 = vunpack.c.h.bf16 %v3026_v1  ;;  %v1326_v5 = vunpack.c.h.bf16 %v3021_v0  ;;  %s258_s25 = smul.u32 14, %s257_s24  ;;  %v3055_v7 = vld [vmem:[%s3676_s2 + $0x8] sm:$0xff]  }
  0x10   : > { %p252_p4 = scmp.lt.s32.totalorder %s3028_s23, 41  ;;  %vm420_vm1 = vcmask 64512   ;;  %vm1117_vm2 = vcmask 1044480   ;;  %v1536_v16 = vunpack.c.l.bf16 %v3050_v6  ;;  %v749_v17 = vunpack.c.l.bf16 %v3055_v7  ;;  %p273_p6 = scmp.lt.s32.totalorder %s3028_s23, 27 }
  0x11   : > { %2689 = vmatprep.subr.mxu0 %v3031_v2  ;;  %2597 = vmatprep.subr.mxu1 %v2461_v4  ;;  %p259_p5 = scmp.lt.s32.totalorder %s258_s25, 41  ;;  %vm1327_vm3 = vcmask 1043456   ;;  %vm1694_vm4 = vcmask 1042432   ;;  %vm1904_vm5 = vcmask 1041408   ;;  %vm750_vm6 = vcmask 1045504  }
  0x12   : > { %2690 = vmatpush3.msra.mxu0 %v3031_v2  ;;  %2598 = vmatpush3.msra.mxu1 %v2461_v4  ;;  %s253_s26 = scalar_select %p252_p4, %s3028_s23, 41 }
  0x13   : > { %2712 = vmatprep.subr.mxu0 %v1326_v5  ;;  %2620 = vmatprep.subr.mxu1 %v2460_v3  ;;  %s3704_s25 = smov (!%p259_p5, %s258_s25), 41  ;;  %s3706_s23 = smov (!%p273_p6, %s3028_s23), 27 }
  0x14   : > { %s2309_s27 = sshll.u32 %s253_s26, 2  ;;  %s2310_s9 = sshll.u32 %s3704_s25, 2 }
  0x15   : > { %s3045_s30 = scalar_lea.vmem %s3674_s0, %s2309_s27  ;;  %s3097_s12 = scalar_lea.vmem %s3675_s1, %s2310_s9 }
  0x16   : > { %v2942_v8 = vld [vmem:[%s3045_s30] sm:$0xff]   ;;  %v2943_v9 = vld [vmem:[%s3045_s30 + $0x8] sm:$0xff]   ;;  %v2944_v12 = vld [vmem:[%s3045_s30 + $0x10] sm:$0xff]   ;;  %s2311_s20 = sshll.u32 %s3706_s23, 3 }
  0x17   : > { %v3061_v10 = vunpack.c.l.bf16 %v2942_v8  ;;  %v3063_v11 = vunpack.c.h.bf16 %v2942_v8  ;;  %v3066_v13 = vunpack.c.l.bf16 %v2943_v9  ;;  %v3068_v14 = vunpack.c.h.bf16 %v2943_v9  ;;  %v2945_v15 = vld [vmem:[%s3045_s30 + $0x18] sm:$0xff]   ;;  %v2946_v22 = vld [vmem:[%s3045_s30 + $0x20] sm:$0xff]   ;;  %v2947_v39 = vld [vmem:[%s3045_s30 + $0x28] sm:$0xff]   ;;  %s3637_s24 = scalar_lea.vmem %s3678_s4, %s2311_s20 }
  0x18   : > { %v3077_v21 = vunpack.c.l.bf16 %v2944_v12  ;;  %v3087_v30 = vunpack.c.h.bf16 %v2944_v12  ;;  %v3108_v40 = vunpack.c.l.bf16 %v2945_v15  ;;  %v3110_v41 = vunpack.c.h.bf16 %v2945_v15  ;;  %v2948_v56 = vld [vmem:[%s3045_s30 + $0x30] sm:$0xff]  }
  0x19   : > { %v391_v18 = vrot.slane %v3061_v10, 1  ;;  %v392_v19 = vrot.slane %v3063_v11, 1  ;;  %v1118_v20 = vrot.slane %v3063_v11, 3  ;;  %v1119_v23 = vrot.slane %v3066_v13, 3 }
  0x1a   : > { %v394_v24 = vrot.slane %v3066_v13, 1  ;;  %v1121_v25 = vrot.slane %v3068_v14, 3  ;;  %v396_v26 = vrot.slane %v3068_v14, 1  ;;  %v1123_v28 = vrot.slane %v3077_v21, 3 }
  0x1b   : > { %v393_v27 = vsel %vm390_vm0, %v391_v18, %v392_v19  ;;  %v398_v29 = vrot.slane %v3077_v21, 1  ;;  %v1120_v31 = vsel %vm1117_vm2, %v1118_v20, %v1119_v23  ;;  %v1125_v37 = vrot.slane %v3087_v30, 3 }
  0x1c   : > { %2599 = vmatprep.mubr.msk.f32.mxu1 %vm420_vm1, %v393_v27  ;;  %v395_v32 = vsel %vm390_vm0, %v392_v19, %v394_v24  ;;  %v1122_v33 = vsel %vm1117_vm2, %v1119_v23, %v1121_v25  ;;  %v397_v34 = vsel %vm390_vm0, %v394_v24, %v396_v26  ;;  %2691 = vmatprep.mubr.msk.f32.mxu0 %vm420_vm1, %v1120_v31  ;;  %v400_v38 = vrot.slane %v3087_v30, 1 }
  0x1d   : > { %2600 = vmatmul.mubr.msk.f32.vlgmr.msra.gmra.mrb[0].mxu1 %vm420_vm1, %v395_v32  ;;  %v1124_v35 = vsel %vm1117_vm2, %v1121_v25, %v1123_v28  ;;  %v399_v36 = vsel %vm390_vm0, %v396_v26, %v398_v29  ;;  %2692 = vmatmul.mubr.msk.f32.vlgmr.msra.gmra.mrb[0].mxu0 %vm420_vm1, %v1122_v33  ;;  %v3112_v42 = vunpack.c.l.bf16 %v2946_v22  ;;  %v3114_v43 = vunpack.c.h.bf16 %v2946_v22 }
  0x1e   : > { %2602 = vmatprep.mubr.msk.f32.mxu1 %vm420_vm1, %v397_v34  ;;  %2713 = vmatpush3.msra.mxu0 %v1326_v5  ;;  %v1126_v44 = vsel %vm1117_vm2, %v1123_v28, %v1125_v37  ;;  %v401_v45 = vsel %vm390_vm0, %v398_v29, %v400_v38  ;;  %v1127_v46 = vrot.slane %v3108_v40, 3  ;;  %v402_v47 = vrot.slane %v3108_v40, 1  ;;  %v3160_v5 = vld [vmem:[%s3097_s12] sm:$0xff]  }
  0x1f   : > { %2694 = vmatprep.mubr.msk.f32.mxu0 %vm420_vm1, %v1124_v35  ;;  %2621 = vmatpush3.msra.mxu1 %v2460_v3  ;;  %v1129_v48 = vrot.slane %v3110_v41, 3  ;;  %v404_v49 = vrot.slane %v3110_v41, 1  ;;  %v1131_v50 = vrot.slane %v3112_v42, 3  ;;  %v406_v51 = vrot.slane %v3112_v42, 1 }
  0x20   : > { %2735 = vmatprep.subr.mxu0 %v1536_v16  ;;  %2643 = vmatprep.subr.mxu1 %v749_v17  ;;  %v1128_v52 = vsel %vm1117_vm2, %v1125_v37, %v1127_v46  ;;  %v403_v53 = vsel %vm390_vm0, %v400_v38, %v402_v47  ;;  %v1133_v54 = vrot.slane %v3114_v43, 3  ;;  %v3137_v55 = vunpack.c.l.bf16 %v2947_v39 }
  0x21   : > { %2603 = vmatmul.mubr.msk.f32.gmra.mrb[2].mxu1 %vm420_vm1, %v399_v36  ;;  %2695 = vmatmul.mubr.msk.f32.gmra.mrb[2].mxu0 %vm420_vm1, %v1126_v44  ;;  %v1130_v57 = vsel %vm1117_vm2, %v1127_v46, %v1129_v48  ;;  %v405_v58 = vsel %vm390_vm0, %v402_v47, %v404_v49  ;;  %v408_v59 = vrot.slane %v3114_v43, 1  ;;  %v1132_v60 = vsel %vm1117_vm2, %v1129_v48, %v1131_v50 }
  0x22   : > { %2605 = vmatprep.mubr.msk.f32.mxu1 %vm420_vm1, %v401_v45  ;;  %2697 = vmatprep.mubr.msk.f32.mxu0 %vm420_vm1, %v1128_v52  ;;  %v1328_v61 = vrot.slane %v3063_v11, 4  ;;  %v1329_v62 = vrot.slane %v3066_v13, 4  ;;  %v3148_v63 = vunpack.c.h.bf16 %v2947_v39  ;;  %v407_v0 = vsel %vm390_vm0, %v404_v49, %v406_v51 }
  0x23   : > { %v1134_v1 = vsel %vm1117_vm2, %v1131_v50, %v1133_v54  ;;  %v410_v3 = vrot.slane %v3137_v55, 1  ;;  %v3157_v4 = vunpack.c.l.bf16 %v2948_v56  ;;  %v409_v8 = vsel %vm390_vm0, %v406_v51, %v408_v59 }
  0x24   : > { %v1331_v9 = vrot.slane %v3068_v14, 4  ;;  %v412_v12 = vrot.slane %v3148_v63, 1  ;;  %v3166_v15 = vunpack.c.h.bf16 %v2948_v56  ;;  %v1330_v18 = vsel %vm1327_vm3, %v1328_v61, %v1329_v62 }
  0x25   : > { %2606 = vmatmul.mubr.msk.f32.gmra.mrb[4].mxu1 %vm420_vm1, %v403_v53  ;;  %2698 = vmatmul.mubr.msk.f32.gmra.mrb[4].mxu0 %vm420_vm1, %v1130_v57  ;;  %v1333_v19 = vrot.slane %v3077_v21, 4  ;;  %v411_v20 = vsel %vm390_vm0, %v408_v59, %v410_v3  ;;  %v414_v22 = vrot.slane %v3157_v4, 1  ;;  %v3176_v23 = vunpack.c.l.bf16 %v3160_v5 }
  0x26   : > { %2608 = vmatprep.mubr.msk.f32.mxu1 %vm420_vm1, %v405_v58  ;;  %2700 = vmatprep.mubr.msk.f32.mxu0 %vm420_vm1, %v1132_v60  ;;  %v3180_v24 = vsel %vm1327_vm3, %v1329_v62, %v1331_v9  ;;  %v413_v25 = vsel %vm390_vm0, %v410_v3, %v412_v12  ;;  %v1335_v26 = vrot.slane %v3087_v30, 4  ;;  %v416_v27 = vrot.slane %v3166_v15, 1 }
  0x27   : > { %v3186_v28 = vsel %vm1327_vm3, %v1331_v9, %v1333_v19  ;;  %v1337_v29 = vrot.slane %v3108_v40, 4  ;;  %v3682_v31 = vunpack.c.h.bf16 %v3050_v6  ;;  %v415_v32 = vsel %vm390_vm0, %v412_v12, %v414_v22 }
  0x28   : > { %v418_v33 = vrot.slane %v3176_v23, 1  ;;  %v3201_v34 = vsel %vm1327_vm3, %v1333_v19, %v1335_v26  ;;  %v417_v35 = vsel %vm390_vm0, %v414_v22, %v416_v27  ;;  %v1339_v36 = vrot.slane %v3110_v41, 4 }
  0x29   : > { %2609 = vmatmul.mubr.msk.f32.gmra.mrb[6].mxu1 %vm420_vm1, %v407_v0  ;;  %2701 = vmatmul.mubr.msk.f32.gmra.mrb[6].mxu0 %vm420_vm1, %v1134_v1  ;;  %v3206_v37 = vsel %vm1327_vm3, %v1335_v26, %v1337_v29  ;;  %v1341_v38 = vrot.slane %v3112_v42, 4  ;;  %v1343_v39 = vrot.slane %v3114_v43, 4  ;;  %v1345_v45 = vrot.slane %v3137_v55, 4 }
  0x2a   : > { %2611 = vmatprep.mubr.msk.f32.mxu1 %vm420_vm1, %v409_v8  ;;  %2714 = vmatprep.mubr.msk.f32.mxu0 %vm420_vm1, %v1330_v18  ;;  %v3220_v44 = vsel %vm1327_vm3, %v1337_v29, %v1339_v36  ;;  %v1695_v46 = vrot.slane %v3066_v13, 5  ;;  %v1696_v47 = vrot.slane %v3068_v14, 5  ;;  %v1698_v49 = vrot.slane %v3077_v21, 5 }
  0x2b   : > { %v3226_v48 = vsel %vm1327_vm3, %v1339_v36, %v1341_v38  ;;  %v3681_v50 = vunpack.c.h.bf16 %v3055_v7  ;;  %v1700_v52 = vrot.slane %v3087_v30, 5  ;;  %v3240_v53 = vsel %vm1327_vm3, %v1341_v38, %v1343_v39 }
  0x2c   : > { %v3232_v51 = vsel %vm1694_vm4, %v1695_v46, %v1696_v47  ;;  %v1347_v56 = vrot.slane %v3148_v63, 4  ;;  %v1349_v57 = vrot.slane %v3157_v4, 4  ;;  %v3245_v58 = vsel %vm1694_vm4, %v1696_v47, %v1698_v49 }
  0x2d   : > { %2612 = vmatmul.mubr.msk.f32.gmra.mrb[8].mxu1 %vm420_vm1, %v411_v20  ;;  %2715 = vmatmul.mubr.msk.f32.vlgmr.msra.gmra.mrb[0].mxu0 %vm420_vm1, %v3180_v24  ;;  %v3250_v59 = vsel %vm1327_vm3, %v1343_v39, %v1345_v45  ;;  %v3253_v60 = vsel %vm1694_vm4, %v1698_v49, %v1700_v52  ;;  %v1702_v61 = vrot.slane %v3108_v40, 5  ;;  %v1704_v62 = vrot.slane %v3110_v41, 5 }
  0x2e   : > { %2614 = vmatprep.mubr.msk.f32.mxu1 %vm420_vm1, %v413_v25  ;;  %2736 = vmatpush3.msra.mxu0 %v1536_v16  ;;  %v419_v16 = vsel %vm390_vm0, %v416_v27, %v418_v33  ;;  %v1351_v0 = vrot.slane %v3166_v15, 4  ;;  %v3259_v1 = vunpack.c.h.bf16 %v3160_v5  ;;  %v1706_v3 = vrot.slane %v3112_v42, 5 }
  0x2f   : > { %2717 = vmatprep.mubr.msk.f32.mxu0 %vm420_vm1, %v3186_v28  ;;  %2758 = vmatprep.subr.mxu0 %v3682_v31  ;;  %v1708_v8 = vrot.slane %v3114_v43, 5  ;;  %v1353_v9 = vrot.slane %v3176_v23, 4  ;;  %v3267_v12 = vsel %vm1694_vm4, %v1700_v52, %v1702_v61  ;;  %v3270_v18 = vsel %vm1694_vm4, %v1702_v61, %v1704_v62 }
  0x30   : > { %v1710_v19 = vrot.slane %v3137_v55, 5  ;;  %v3278_v5 = vsel %vm1327_vm3, %v1345_v45, %v1347_v56  ;;  %v3281_v20 = vsel %vm1694_vm4, %v1704_v62, %v1706_v3  ;;  %v1712_v25 = vrot.slane %v3148_v63, 5 }
  0x31   : > { %2615 = vmatmul.mubr.msk.f32.gmra.mrb[10].mxu1 %vm420_vm1, %v415_v32  ;;  %2718 = vmatmul.mubr.msk.f32.gmra.mrb[2].mxu0 %vm420_vm1, %v3201_v34  ;;  %v3284_v22 = vsel %vm1694_vm4, %v1706_v3, %v1708_v8  ;;  %v1714_v27 = vrot.slane %v3157_v4, 5  ;;  %v1716_v29 = vrot.slane %v3166_v15, 5  ;;  %v3679_v32 = vrot.slane %v3176_v23, 5 }
  0x32   : > { %2617 = vmatprep.mubr.msk.f32.mxu1 %vm420_vm1, %v417_v35  ;;  %2720 = vmatprep.mubr.msk.f32.mxu0 %vm420_vm1, %v3206_v37  ;;  %v3292_v26 = vsel %vm1694_vm4, %v1708_v8, %v1710_v19  ;;  %v3298_v33 = vsel %vm1327_vm3, %v1347_v56, %v1349_v57  ;;  %v3680_v35 = vrot.slane %v3259_v1, 4  ;;  %v3304_v36 = vsel %vm1694_vm4, %v1710_v19, %v1712_v25 }
  0x33   : > { %v3310_v38 = vsel %vm1694_vm4, %v1712_v25, %v1714_v27  ;;  %v3318_v39 = vsel %vm1694_vm4, %v1716_v29, %v3679_v32  ;;  %v1906_v45 = vrot.slane %v3068_v14, 6  ;;  %v3326_v46 = vsel %vm1327_vm3, %v1349_v57, %v1351_v0 }
  0x34   : > { %v1908_v47 = vrot.slane %v3077_v21, 6  ;;  %v1910_v49 = vrot.slane %v3087_v30, 6  ;;  %v3333_v52 = vsel %vm1327_vm3, %v1351_v0, %v1353_v9  ;;  %v1912_v61 = vrot.slane %v3108_v40, 6 }
  0x35   : > { %2618 = vmatmul.mubr.msk.f32.gmra.mrb[12].mxu1 %vm420_vm1, %v419_v16  ;;  %2721 = vmatmul.mubr.msk.f32.gmra.mrb[4].mxu0 %vm420_vm1, %v3220_v44  ;;  %v3313_v16 = vsel %vm1694_vm4, %v1714_v27, %v1716_v29  ;;  %v1914_v62 = vrot.slane %v3110_v41, 6  ;;  %v1916_v8 = vrot.slane %v3112_v42, 6  ;;  %v1135_v19 = vrot.slane %v3137_v55, 3 }
  0x36   : > { %2622 = vmatprep.mubr.msk.f32.mxu1 %vm420_vm1, %v3061_v10  ;;  %2723 = vmatprep.mubr.msk.f32.mxu0 %vm420_vm1, %v3226_v48  ;;  %v3341_v57 = vsel %vm1904_vm5, %v1906_v45, %v1908_v47  ;;  %v3344_v3 = vsel %vm1904_vm5, %v1908_v47, %v1910_v49  ;;  %v3353_v0 = vsel %vm1327_vm3, %v1353_v9, %v3680_v35  ;;  %v1918_v29 = vrot.slane %v3114_v43, 6 }
  0x37   : > { %v3356_v25 = vsel %vm1904_vm5, %v1910_v49, %v1912_v61  ;;  %v3359_v27 = vsel %vm1904_vm5, %v1912_v61, %v1914_v62  ;;  %v3372_v9 = vsel %vm1117_vm2, %v1133_v54, %v1135_v19  ;;  %v1920_v47 = vrot.slane %v3137_v55, 6 }
  0x38   : > { %v3379_v49 = vsel %vm1904_vm5, %v1916_v8, %v1918_v29  ;;  %v1139_v61 = vrot.slane %v3157_v4, 3  ;;  %v1141_v32 = vrot.slane %v3166_v15, 3  ;;  %v1143_v31 = vrot.slane %v3176_v23, 3 }
  0x39   : > { %2623 = vmatmul.mubr.msk.f32.vlgmr.msra.gmra.mrb[0].mxu1 %vm420_vm1, %v3063_v11  ;;  %2724 = vmatmul.mubr.msk.f32.gmra.mrb[6].mxu0 %vm420_vm1, %v3240_v53  ;;  %3683 = vst [vmem:[#allocation2_spill] sm:$0xff] %v3379_v49  ;;  %v3388_v54 = vsel %vm1904_vm5, %v1918_v29, %v1920_v47 }
  0x3a   : > { %2625 = vmatprep.mubr.msk.f32.mxu1 %vm420_vm1, %v3066_v13  ;;  %2726 = vmatprep.mubr.msk.f32.mxu0 %vm420_vm1, %v3250_v59  ;;  %3685 = vst [vmem:[#allocation4_spill] sm:$0xff] %v3388_v54  ;;  %v3406_v29 = vsel %vm1117_vm2, %v1139_v61, %v1141_v32  ;;  %v1926_v54 = vrot.slane %v3166_v15, 6 }
  0x3b   : > { %2644 = vmatpush3.msra.mxu1 %v749_v17  ;;  %v1905_v17 = vrot.slane %v3066_v13, 6  ;;  %3688 = vst [vmem:[#allocation7_spill] sm:$0xff] %v3406_v29  ;;  %v1930_v29 = vrot.slane %v3259_v1, 6 }
  0x3c   : > { %2666 = vmatprep.subr.mxu1 %v3681_v50  ;;  %v1924_v50 = vrot.slane %v3157_v4, 6 }
  0x3d   : > { %2626 = vmatmul.mubr.msk.f32.gmra.mrb[2].mxu1 %vm420_vm1, %v3068_v14  ;;  %2727 = vmatmul.mubr.msk.f32.gmra.mrb[8].mxu0 %vm420_vm1, %v3278_v5  ;;  %v3336_v56 = vsel %vm1904_vm5, %v1905_v17, %v1906_v45  ;;  %v3367_v17 = vsel %vm1904_vm5, %v1914_v62, %v1916_v8  ;;  %v1137_v45 = vrot.slane %v3148_v63, 3  ;;  %v1922_v62 = vrot.slane %v3148_v63, 6  ;;  %v3397_v8 = vld [vmem:[%s3676_s2 + $0x20] sm:$0xf] }
  0x3e   : > { %2628 = vmatprep.mubr.msk.f32.mxu1 %vm420_vm1, %v3077_v21  ;;  %2729 = vmatprep.mubr.msk.f32.mxu0 %vm420_vm1, %v3298_v33 }
  0x3f   : > { %v3385_v35 = vsel %vm1117_vm2, %v1135_v19, %v1137_v45  ;;  %v3400_v49 = vsel %vm1117_vm2, %v1137_v45, %v1139_v61  ;;  %v3403_v19 = vsel %vm1904_vm5, %v1920_v47, %v1922_v62  ;;  %v3417_v45 = vsel %vm1117_vm2, %v1141_v32, %v1143_v31 }
  0x40   : > { %3684 = vst [vmem:[#allocation3_spill] sm:$0xff] %v3385_v35  ;;  %3686 = vst [vmem:[#allocation5_spill] sm:$0xff] %v3400_v49  ;;  %v3414_v35 = vsel %vm1904_vm5, %v1922_v62, %v1924_v50  ;;  %v1145_v47 = vrot.slane %v3259_v1, 3  ;;  %v3424_v61 = vsel %vm1904_vm5, %v1924_v50, %v1926_v54  ;;  %v1903_v49 = vunpack.c.l.bf16 %v3397_v8 }
  0x41   : > { %2629 = vmatmul.mubr.msk.f32.gmra.mrb[4].mxu1 %vm420_vm1, %v3087_v30  ;;  %2730 = vmatmul.mubr.msk.f32.gmra.mrb[10].mxu0 %vm420_vm1, %v3326_v46  ;;  %3687 = vst [vmem:[#allocation6_spill] sm:$0xff] %v3403_v19  ;;  %v1928_v19 = vrot.slane %v3176_v23, 6  ;;  %v751_v50 = vrot.slane %v3061_v10, 2 }
  0x42   : > { %2631 = vmatprep.mubr.msk.f32.mxu1 %vm420_vm1, %v3108_v40  ;;  %2732 = vmatprep.mubr.msk.f32.mxu0 %vm420_vm1, %v3333_v52  ;;  %v3429_v62 = vsel %vm1117_vm2, %v1143_v31, %v1145_v47  ;;  %v3689_v31 = vunpack.c.h.bf16 %v3050_v6  ;;  %v754_v6 = vrot.slane %v3066_v13, 2 }
  0x43   : > { %v3432_v32 = vsel %vm1904_vm5, %v1926_v54, %v1928_v19  ;;  %v752_v54 = vrot.slane %v3063_v11, 2  ;;  %v756_v11 = vrot.slane %v3068_v14, 2  ;;  %v2950_v14 = vld [vmem:[%s3097_s12 + $0x8] sm:$0xf]  }
  0x45   : > { %2632 = vmatmul.mubr.msk.f32.gmra.mrb[6].mxu1 %vm420_vm1, %v3110_v41  ;;  %2733 = vmatmul.mubr.msk.f32.gmra.mrb[12].mxu0 %vm420_vm1, %v3353_v0  ;;  %v753_v10 = vsel %vm750_vm6, %v751_v50, %v752_v54  ;;  %v757_v13 = vsel %vm750_vm6, %v754_v6, %v756_v11  ;;  %v776_v50 = vrot.slane %v3166_v15, 2 }
  0x46   : > { %2634 = vmatprep.mubr.msk.f32.mxu1 %vm420_vm1, %v3112_v42  ;;  %2737 = vmatprep.mubr.msk.f32.mxu0 %vm420_vm1, %v3180_v24  ;;  %v3439_v24 = vsel %vm1904_vm5, %v1928_v19, %v1930_v29  ;;  %v3488_v19 = vunpack.c.l.bf16 %v2950_v14 }
  0x49   : > { %2635 = vmatmul.mubr.msk.f32.gmra.mrb[8].mxu1 %vm420_vm1, %v3114_v43  ;;  %2738 = vmatmul.mubr.msk.f32.vlgmr.msra.gmra.mrb[0].mxu0 %vm420_vm1, %v3186_v28  ;;  %v755_v28 = vsel %vm750_vm6, %v752_v54, %v754_v6  ;;  %v778_v54 = vrot.slane %v3176_v23, 2 }
  0x4a   : > { %2637 = vmatprep.mubr.msk.f32.mxu1 %vm420_vm1, %v3137_v55  ;;  %2759 = vmatpush3.msra.mxu0 %v3689_v31  ;;  %v772_v31 = vrot.slane %v3148_v63, 2 }
  0x4b   : > { %2740 = vmatprep.mubr.msk.f32.mxu0 %vm420_vm1, %v3201_v34  ;;  %2781 = vmatprep.subr.mxu0 %v1903_v49  ;;  %v758_v34 = vrot.slane %v3077_v21, 2  ;;  %v3690_v21 = vunpack.c.h.bf16 %v3055_v7  ;;  %v766_v7 = vrot.slane %v3112_v42, 2  ;;  %v770_v42 = vrot.slane %v3137_v55, 2 }
  0x4c   : > { %v774_v55 = vrot.slane %v3157_v4, 2 }
  0x4d   : > { %2638 = vmatmul.mubr.msk.f32.gmra.mrb[10].mxu1 %vm420_vm1, %v3148_v63  ;;  %2741 = vmatmul.mubr.msk.f32.gmra.mrb[2].mxu0 %vm420_vm1, %v3206_v37  ;;  %v760_v37 = vrot.slane %v3087_v30, 2 }
  0x4e   : > { %2640 = vmatprep.mubr.msk.f32.mxu1 %vm420_vm1, %v3157_v4  ;;  %2743 = vmatprep.mubr.msk.f32.mxu0 %vm420_vm1, %v3220_v44  ;;  %v759_v44 = vsel %vm750_vm6, %v756_v11, %v758_v34  ;;  %v775_v63 = vsel %vm750_vm6, %v772_v31, %v774_v55  ;;  %v777_v4 = vsel %vm750_vm6, %v774_v55, %v776_v50 }
  0x4f   : > { %v761_v30 = vsel %vm750_vm6, %v758_v34, %v760_v37 }
  0x51   : > { %2641 = vmatmul.mubr.msk.f32.gmra.mrb[12].mxu1 %vm420_vm1, %v3166_v15  ;;  %2744 = vmatmul.mubr.msk.f32.gmra.mrb[4].mxu0 %vm420_vm1, %v3226_v48  ;;  %v762_v48 = vrot.slane %v3108_v40, 2  ;;  %v779_v15 = vsel %vm750_vm6, %v776_v50, %v778_v54 }
  0x52   : > { %2645 = vmatprep.mubr.msk.f32.mxu1 %vm420_vm1, %v753_v10  ;;  %2746 = vmatprep.mubr.msk.f32.mxu0 %vm420_vm1, %v3240_v53  ;;  %v764_v53 = vrot.slane %v3110_v41, 2 }
  0x53   : > { %v763_v40 = vsel %vm750_vm6, %v760_v37, %v762_v48 }
  0x54   : > { %v765_v41 = vsel %vm750_vm6, %v762_v48, %v764_v53 }
  0x55   : > { %2646 = vmatmul.mubr.msk.f32.vlgmr.msra.gmra.mrb[0].mxu1 %vm420_vm1, %v755_v28  ;;  %2747 = vmatmul.mubr.msk.f32.gmra.mrb[6].mxu0 %vm420_vm1, %v3250_v59  ;;  %v1538_v59 = vrot.slane %v3488_v19, 4 }
  0x56   : > { %2648 = vmatprep.mubr.msk.f32.mxu1 %vm420_vm1, %v757_v13  ;;  %2749 = vmatprep.mubr.msk.f32.mxu0 %vm420_vm1, %v3278_v5  ;;  %v768_v5 = vrot.slane %v3114_v43, 2 }
  0x57   : > { %2667 = vmatpush3.msra.mxu1 %v3690_v21 }
  0x58   : > { %2804 = vmatprep.subr.mxu1 %v3031_v2  ;;  %v769_v43 = vsel %vm750_vm6, %v766_v7, %v768_v5 }
  0x59   : > { %2649 = vmatmul.mubr.msk.f32.gmra.mrb[2].mxu1 %vm420_vm1, %v759_v44  ;;  %2750 = vmatmul.mubr.msk.f32.gmra.mrb[8].mxu0 %vm420_vm1, %v3298_v33  ;;  %v767_v33 = vsel %vm750_vm6, %v764_v53, %v766_v7 }
  0x5a   : > { %2651 = vmatprep.mubr.msk.f32.mxu1 %vm420_vm1, %v761_v30  ;;  %2752 = vmatprep.mubr.msk.f32.mxu0 %vm420_vm1, %v3326_v46  ;;  %v3691_v46 = vrot.slane %v3259_v1, 4 }
  0x5c   : > { %v1539_v47 = vsel %vm1327_vm3, %v3691_v46, %v1538_v59 }
  0x5d   : > { %2652 = vmatmul.mubr.msk.f32.gmra.mrb[4].mxu1 %vm420_vm1, %v763_v40  ;;  %2753 = vmatmul.mubr.msk.f32.gmra.mrb[10].mxu0 %vm420_vm1, %v3333_v52  ;;  %v771_v52 = vsel %vm750_vm6, %v768_v5, %v770_v42 }
  0x5e   : > { %2654 = vmatprep.mubr.msk.f32.mxu1 %vm420_vm1, %v765_v41  ;;  %2755 = vmatprep.mubr.msk.f32.mxu0 %vm420_vm1, %v3353_v0  ;;  %v773_v0 = vsel %vm750_vm6, %v770_v42, %v772_v31 }
  0x61   : > { %2655 = vmatmul.mubr.msk.f32.gmra.mrb[6].mxu1 %vm420_vm1, %v767_v33  ;;  %2756 = vmatmul.mubr.msk.f32.gmra.mrb[12].mxu0 %vm420_vm1, %v1539_v47 }
  0x62   : > { %2657 = vmatprep.mubr.msk.f32.mxu1 %vm420_vm1, %v769_v43  ;;  %2760 = vmatprep.mubr.msk.f32.mxu0 %vm420_vm1, %v3232_v51  ;;  %v1720_v51 = vrot.slane %v3259_v1, 5 }
  0x65   : > { %2658 = vmatmul.mubr.msk.f32.gmra.mrb[8].mxu1 %vm420_vm1, %v771_v52  ;;  %2761 = vmatmul.mubr.msk.f32.vlgmr.msra.gmra.mrb[0].mxu0 %vm420_vm1, %v3245_v58  ;;  %v1722_v58 = vrot.slane %v3488_v19, 5 }
  0x66   : > { %2660 = vmatprep.mubr.msk.f32.mxu1 %vm420_vm1, %v773_v0  ;;  %2782 = vmatpush3.msra.mxu0 %v1903_v49 }
  0x67   : > { %2763 = vmatprep.mubr.msk.f32.mxu0 %vm420_vm1, %v3253_v60  ;;  %v3692_v60 = vrot.slane %v3176_v23, 5  ;;  %v961_v23 = vrot.slane %v3259_v1, 2 }
  0x69   : > { %2661 = vmatmul.mubr.msk.f32.gmra.mrb[10].mxu1 %vm420_vm1, %v775_v63  ;;  %2764 = vmatmul.mubr.msk.f32.gmra.mrb[2].mxu0 %vm420_vm1, %v3267_v12  ;;  %v1721_v12 = vsel %vm1694_vm4, %v3692_v60, %v1720_v51 }
  0x6a   : > { %2663 = vmatprep.mubr.msk.f32.mxu1 %vm420_vm1, %v777_v4  ;;  %2766 = vmatprep.mubr.msk.f32.mxu0 %vm420_vm1, %v3270_v18  ;;  %v962_v18 = vsel %vm750_vm6, %v778_v54, %v961_v23 }
  0x6d   : > { %2664 = vmatmul.mubr.msk.f32.gmra.mrb[12].mxu1 %vm420_vm1, %v779_v15  ;;  %2767 = vmatmul.mubr.msk.f32.gmra.mrb[4].mxu0 %vm420_vm1, %v3281_v20  ;;  %v3693_v20 = vld [vmem:[#allocation2_spill] sm:$0xff] }
  0x6e   : > { %2668 = vmatprep.mubr.msk.f32.mxu1 %vm420_vm1, %v755_v28  ;;  %2769 = vmatprep.mubr.msk.f32.mxu0 %vm420_vm1, %v3284_v22  ;;  %v3694_v22 = vld [vmem:[#allocation3_spill] sm:$0xff] }
  0x71   : > { %2669 = vmatmul.mubr.msk.f32.vlgmr.msra.gmra.mrb[0].mxu1 %vm420_vm1, %v757_v13  ;;  %2770 = vmatmul.mubr.msk.f32.gmra.mrb[6].mxu0 %vm420_vm1, %v3292_v26  ;;  %v3695_v26 = vld [vmem:[#allocation4_spill] sm:$0xff] }
  0x72   : > { %2671 = vmatprep.mubr.msk.f32.mxu1 %vm420_vm1, %v759_v44  ;;  %2772 = vmatprep.mubr.msk.f32.mxu0 %vm420_vm1, %v3304_v36  ;;  %v3696_v36 = vld [vmem:[#allocation5_spill] sm:$0xff] }
  0x73   : > { %2805 = vmatpush3.msra.mxu1 %v3031_v2  ;;  %v1723_v2 = vsel %vm1694_vm4, %v1720_v51, %v1722_v58 }
  0x75   : > { %2672 = vmatmul.mubr.msk.f32.gmra.mrb[2].mxu1 %vm420_vm1, %v761_v30  ;;  %2773 = vmatmul.mubr.msk.f32.gmra.mrb[8].mxu0 %vm420_vm1, %v3310_v38  ;;  %v3697_v38 = vld [vmem:[#allocation6_spill] sm:$0xff] }
  0x76   : > { %2674 = vmatprep.mubr.msk.f32.mxu1 %vm420_vm1, %v763_v40  ;;  %2775 = vmatprep.mubr.msk.f32.mxu0 %vm420_vm1, %v3313_v16  ;;  %v3698_v16 = vld [vmem:[#allocation7_spill] sm:$0xff] }
  0x79   : > { %2675 = vmatmul.mubr.msk.f32.gmra.mrb[4].mxu1 %vm420_vm1, %v765_v41  ;;  %2776 = vmatmul.mubr.msk.f32.gmra.mrb[10].mxu0 %vm420_vm1, %v3318_v39  ;;  %v1932_v39 = vrot.slane %v3488_v19, 6 }
  0x7a   : > { %2677 = vmatprep.mubr.msk.f32.mxu1 %vm420_vm1, %v767_v33  ;;  %2778 = vmatprep.mubr.msk.f32.mxu0 %vm420_vm1, %v1721_v12 }
  0x7d   : > { %2678 = vmatmul.mubr.msk.f32.gmra.mrb[6].mxu1 %vm420_vm1, %v769_v43  ;;  %2779 = vmatmul.mubr.msk.f32.gmra.mrb[12].mxu0 %vm420_vm1, %v1723_v2 }
  0x7e   : > { %2680 = vmatprep.mubr.msk.f32.mxu1 %vm420_vm1, %v771_v52  ;;  %2783 = vmatprep.mubr.msk.f32.mxu0 %vm420_vm1, %v3336_v56 }
  0x81   : > { %2681 = vmatmul.mubr.msk.f32.gmra.mrb[8].mxu1 %vm420_vm1, %v773_v0  ;;  %2784 = vmatmul.mubr.msk.f32.vlgmr.msra.gmra.mrb[0].mxu0 %vm420_vm1, %v3341_v57 }
  0x82   : > { %2683 = vmatprep.mubr.msk.f32.mxu1 %vm420_vm1, %v775_v63  ;;  %2786 = vmatprep.mubr.msk.f32.mxu0 %vm420_vm1, %v3344_v3 }
  0x85   : > { %2684 = vmatmul.mubr.msk.f32.gmra.mrb[10].mxu1 %vm420_vm1, %v777_v4  ;;  %2787 = vmatmul.mubr.msk.f32.gmra.mrb[2].mxu0 %vm420_vm1, %v3356_v25 }
  0x86   : > { %2686 = vmatprep.mubr.msk.f32.mxu1 %vm420_vm1, %v779_v15  ;;  %2789 = vmatprep.mubr.msk.f32.mxu0 %vm420_vm1, %v3359_v27 }
  0x89   : > { %2687 = vmatmul.mubr.msk.f32.gmra.mrb[12].mxu1 %vm420_vm1, %v962_v18  ;;  %2790 = vmatmul.mubr.msk.f32.gmra.mrb[4].mxu0 %vm420_vm1, %v3367_v17 }
  0x8a   : > { %2703 = vmatprep.mubr.msk.f32.mxu1 %vm420_vm1, %v3372_v9  ;;  %2792 = vmatprep.mubr.msk.f32.mxu0 %vm420_vm1, %v3693_v20 }
  0x8d   : > { %2704 = vmatmul.mubr.msk.f32.vlgmr.msra.gmra.mrb[8].mxu1 %vm420_vm1, %v3694_v22  ;;  %2793 = vmatmul.mubr.msk.f32.gmra.mrb[6].mxu0 %vm420_vm1, %v3695_v26 }
  0x8e   : > { %2706 = vmatprep.mubr.msk.f32.mxu1 %vm420_vm1, %v3696_v36  ;;  %2795 = vmatprep.mubr.msk.f32.mxu0 %vm420_vm1, %v3697_v38 }
  0x91   : > { %2707 = vmatmul.mubr.msk.f32.gmra.mrb[10].mxu1 %vm420_vm1, %v3698_v16  ;;  %2796 = vmatmul.mubr.msk.f32.gmra.mrb[8].mxu0 %vm420_vm1, %v3414_v35  ;;  %v1933_v35 = vsel %vm1904_vm5, %v1930_v29, %v1932_v39 }
  0x92   : > { %2709 = vmatprep.mubr.msk.f32.mxu1 %vm420_vm1, %v3417_v45  ;;  %2798 = vmatprep.mubr.msk.f32.mxu0 %vm420_vm1, %v3424_v61  ;;  %v3630_v45 = vld [vmem:[%s3677_s3] ss:$0 sm:$0xff] }
  0x95   : > { %2710 = vmatmul.mubr.msk.f32.gmra.mrb[12].mxu1 %vm420_vm1, %v3429_v62  ;;  %2799 = vmatmul.mubr.msk.f32.gmra.mrb[10].mxu0 %vm420_vm1, %v3432_v32 }
  0x96   : > { %2801 = vmatprep.mubr.msk.f32.mxu0 %vm420_vm1, %v3439_v24 }
  0x99   : > { %2802 = vmatmul.mubr.msk.f32.gmra.mrb[12].mxu0 %vm420_vm1, %v1933_v35 }
 0x144   : > { %v2670_v56 = vpop.f32.mrb[0].mxu1 }
 0x145   : > { %v1031_v57 = vpop.f32.mrb[1].mxu1 }
 0x148   : > { %v2673_v3 = vpop.f32.mrb[2].mxu1 }
 0x149   : > { %v1041_v25 = vpop.f32.mrb[3].mxu1 }
 0x14c   : > { %v2676_v27 = vpop.f32.mrb[4].mxu1 }
 0x14d   : > { %v1051_v17 = vpop.f32.mrb[5].mxu1 }
 0x150   : > { %v2679_v9 = vpop.f32.mrb[6].mxu1 }
 0x151   : > { %v1061_v49 = vpop.f32.mrb[7].mxu1 }
 0x154   : > { %v2785_v8 = vpop.f32.mrb[0].mxu0 }
 0x155   : > { %v2806_v1 = vadd.f32 %v2785_v8, %v2670_v56  ;;  %v2028_v29 = vpop.f32.mrb[1].mxu0 }
 0x156   : > { %v2807_v61 = vadd.f32 %v2028_v29, %v1031_v57 }
 0x157   : > { %v2119_v62 = vadd.f32 %v2806_v1, %v3630_v45 }
 0x158   : > { %v2118_v32 = vadd.f32 %v2807_v61, %v3630_v45  ;;  %v2788_v24 = vpop.f32.mrb[2].mxu0 }
 0x159   : > { %vm2133_vm7 = vcmp.gt.f32.partialorder %v2119_v62, 0.0  ;;  %v2147_v6 = vmul.f32 0.01, %v2119_v62  ;;  %v2808_v10 = vadd.f32 %v2788_v24, %v2673_v3  ;;  %v2038_v11 = vpop.f32.mrb[3].mxu0 }
 0x15a   : > { %vm2132_vm8 = vcmp.gt.f32.partialorder %v2118_v32, 0.0  ;;  %v2146_v28 = vmul.f32 0.01, %v2118_v32  ;;  %v2809_v34 = vadd.f32 %v2038_v11, %v1041_v25 }
 0x15b   : > { %v2161_v13 = vsel %vm2133_vm7, %v2119_v62, %v2147_v6  ;;  %v2121_v37 = vadd.f32 %v2808_v10, %v3630_v45 }
 0x15c   : > { %2175 = vst [vmem:[%s3637_s24 + $0x8] sm:$0xff] %v2161_v13  ;;  %v2160_v14 = vsel %vm2132_vm8, %v2118_v32, %v2146_v28  ;;  %v2120_v44 = vadd.f32 %v2809_v34, %v3630_v45  ;;  %v2791_v48 = vpop.f32.mrb[4].mxu0 }
 0x15d   : > { %2174 = vst [vmem:[%s3637_s24] sm:$0xff] %v2160_v14  ;;  %vm2135_vm9 = vcmp.gt.f32.partialorder %v2121_v37, 0.0  ;;  %v2149_v21 = vmul.f32 0.01, %v2121_v37  ;;  %v2810_v30 = vadd.f32 %v2791_v48, %v2676_v27  ;;  %v2048_v53 = vpop.f32.mrb[5].mxu0 }
 0x15e   : > { %vm2134_vm10 = vcmp.gt.f32.partialorder %v2120_v44, 0.0  ;;  %v2148_v19 = vmul.f32 0.01, %v2120_v44  ;;  %v2811_v40 = vadd.f32 %v2048_v53, %v1051_v17 }
 0x15f   : > { %v2163_v7 = vsel %vm2135_vm9, %v2121_v37, %v2149_v21  ;;  %v2123_v41 = vadd.f32 %v2810_v30, %v3630_v45 }
 0x160   : > { %v2705_v59 = vpop.f32.mrb[8].mxu1  ;;  %2177 = vst [vmem:[%s3637_s24 + $0x18] sm:$0xff] %v2163_v7  ;;  %v2162_v5 = vsel %vm2134_vm10, %v2120_v44, %v2148_v19  ;;  %v2122_v33 = vadd.f32 %v2811_v40, %v3630_v45  ;;  %v2794_v42 = vpop.f32.mrb[6].mxu0 }
 0x161   : > { %v1281_v46 = vpop.f32.mrb[9].mxu1  ;;  %2176 = vst [vmem:[%s3637_s24 + $0x10] sm:$0xff] %v2162_v5  ;;  %vm2137_vm11 = vcmp.gt.f32.partialorder %v2123_v41, 0.0  ;;  %v2151_v47 = vmul.f32 0.01, %v2123_v41  ;;  %v2812_v43 = vadd.f32 %v2794_v42, %v2679_v9  ;;  %v2058_v31 = vpop.f32.mrb[7].mxu0 }
 0x162   : > { %vm2136_vm12 = vcmp.gt.f32.partialorder %v2122_v33, 0.0  ;;  %v2150_v52 = vmul.f32 0.01, %v2122_v33  ;;  %v2813_v55 = vadd.f32 %v2058_v31, %v1061_v49 }
 0x163   : > { %v2165_v0 = vsel %vm2137_vm11, %v2123_v41, %v2151_v47  ;;  %v2125_v50 = vadd.f32 %v2812_v43, %v3630_v45 }
 0x164   : > { %v2708_v63 = vpop.f32.mrb[10].mxu1  ;;  %2179 = vst [vmem:[%s3637_s24 + $0x28] sm:$0xff] %v2165_v0  ;;  %v2164_v54 = vsel %vm2136_vm12, %v2122_v33, %v2150_v52  ;;  %v2124_v4 = vadd.f32 %v2813_v55, %v3630_v45  ;;  %v2797_v15 = vpop.f32.mrb[8].mxu0 }
 0x165   : > { %v1291_v51 = vpop.f32.mrb[11].mxu1  ;;  %2178 = vst [vmem:[%s3637_s24 + $0x20] sm:$0xff] %v2164_v54  ;;  %vm2139_vm13 = vcmp.gt.f32.partialorder %v2125_v50, 0.0  ;;  %v2153_v58 = vmul.f32 0.01, %v2125_v50  ;;  %v2814_v60 = vadd.f32 %v2797_v15, %v2705_v59  ;;  %v2068_v12 = vpop.f32.mrb[9].mxu0 }
 0x166   : > { %vm2138_vm14 = vcmp.gt.f32.partialorder %v2124_v4, 0.0  ;;  %v2152_v2 = vmul.f32 0.01, %v2124_v4  ;;  %v2815_v23 = vadd.f32 %v2068_v12, %v1281_v46 }
 0x167   : > { %v2167_v18 = vsel %vm2139_vm13, %v2125_v50, %v2153_v58  ;;  %v2127_v20 = vadd.f32 %v2814_v60, %v3630_v45 }
 0x168   : > { %v2711_v22 = vpop.f32.mrb[12].mxu1  ;;  %2181 = vst [vmem:[%s3637_s24 + $0x38] sm:$0xff] %v2167_v18  ;;  %v2166_v26 = vsel %vm2138_vm14, %v2124_v4, %v2152_v2  ;;  %v2126_v36 = vadd.f32 %v2815_v23, %v3630_v45  ;;  %v2800_v38 = vpop.f32.mrb[10].mxu0 }
 0x169   : > { %v1301_v16 = vpop.f32.mrb[13].mxu1  ;;  %2180 = vst [vmem:[%s3637_s24 + $0x30] sm:$0xff] %v2166_v26  ;;  %vm2141_vm15 = vcmp.gt.f32.partialorder %v2127_v20, 0.0  ;;  %v2155_v39 = vmul.f32 0.01, %v2127_v20  ;;  %v2816_v35 = vadd.f32 %v2800_v38, %v2708_v63  ;;  %v2078_v56 = vpop.f32.mrb[11].mxu0 }
 0x16a   : > { %vm2140_vm0 = vcmp.gt.f32.partialorder %v2126_v36, 0.0  ;;  %v2154_v57 = vmul.f32 0.01, %v2126_v36  ;;  %v2817_v3 = vadd.f32 %v2078_v56, %v1291_v51 }
 0x16b   : > { %v2169_v25 = vsel %vm2141_vm15, %v2127_v20, %v2155_v39  ;;  %v2129_v27 = vadd.f32 %v2816_v35, %v3630_v45 }
 0x16c   : > { %2183 = vst [vmem:[%s3637_s24 + $0x48] sm:$0xff] %v2169_v25  ;;  %v2168_v17 = vsel %vm2140_vm0, %v2126_v36, %v2154_v57  ;;  %v2128_v9 = vadd.f32 %v2817_v3, %v3630_v45  ;;  %v2803_v49 = vpop.f32.mrb[12].mxu0 }
 0x16d   : > { %2182 = vst [vmem:[%s3637_s24 + $0x40] sm:$0xff] %v2168_v17  ;;  %vm2143_vm1 = vcmp.gt.f32.partialorder %v2129_v27, 0.0  ;;  %v2157_v8 = vmul.f32 0.01, %v2129_v27  ;;  %v2818_v1 = vadd.f32 %v2803_v49, %v2711_v22  ;;  %v2088_v29 = vpop.f32.mrb[13].mxu0 }
 0x16e   : > { %vm2142_vm2 = vcmp.gt.f32.partialorder %v2128_v9, 0.0  ;;  %v2156_v61 = vmul.f32 0.01, %v2128_v9  ;;  %v2819_v62 = vadd.f32 %v2088_v29, %v1301_v16 }
 0x16f   : > { %v2171_v32 = vsel %vm2143_vm1, %v2129_v27, %v2157_v8  ;;  %v2131_v24 = vadd.f32 %v2818_v1, %v3630_v45 }
 0x170   : > { %2185 = vst [vmem:[%s3637_s24 + $0x58] sm:$0xff] %v2171_v32  ;;  %v2170_v6 = vsel %vm2142_vm2, %v2128_v9, %v2156_v61  ;;  %v2130_v10 = vadd.f32 %v2819_v62, %v3630_v45 }
 0x171   : > { %2184 = vst [vmem:[%s3637_s24 + $0x50] sm:$0xff] %v2170_v6  ;;  %vm2145_vm3 = vcmp.gt.f32.partialorder %v2131_v24, 0.0  ;;  %v2159_v11 = vmul.f32 0.01, %v2131_v24 }
 0x172   : > { %vm2144_vm4 = vcmp.gt.f32.partialorder %v2130_v10, 0.0  ;;  %v2158_v28 = vmul.f32 0.01, %v2130_v10 }
 0x173   : > { %v2173_v34 = vsel %vm2145_vm3, %v2131_v24, %v2159_v11 }
 0x174   : > { %2187 = vst [vmem:[%s3637_s24 + $0x68] sm:$0xff] %v2173_v34  ;;  %v2172_v13 = vsel %vm2144_vm4, %v2130_v10, %v2158_v28 }
 0x175   : > { %2186 = vst [vmem:[%s3637_s24 + $0x60] sm:$0xff] %v2172_v13 }
 0x176 PF: > { %s14_s17 = sadd.s32 1, %s2973_s17   ;;  %s3699_s15 = smov %s2969_s16 }
 0x177   : > { %p11_p7 = scmp.ge.s32.totalorder %s14_s17, 4   ;;  %s3700_s16 = smov %s3702_s18 }
 0x179   :  { %13 = sbr.rel (!%p11_p7) target bundleno = 2 (0x2), region = 83 }

</bundles_post_ra>
